<compile_context>
chip_gen: v6e
topology: v6e:2x2x1
jax: 0.10.0
libtpu: 0.0.40
codegen_flags: <defaults>
</compile_context>

<pallas_src>
import math
from functools import partial

import jax
import jax.numpy as jnp
import numpy as np
from jax import lax
from jax.experimental import pallas as pl
from jax.experimental.pallas import tpu as pltpu

GN_EPS = 1e-5


def _round_up(x, m):
    return (x + m - 1) // m * m


def _pick_tm(m):
    """Largest 16-aligned row tile (<=1024) dividing m with >=2 blocks."""
    best = None
    for c in range(16, min(m // 2, 1024) + 1, 16):
        if m % c == 0:
            best = c
    return best if best is not None else m


def _pick_div_tile(dim, cap, step=128):
    """Largest multiple of `step` <= cap that divides dim (dim is a multiple of step)."""
    best = step if dim % step == 0 else dim
    for c in range(step, min(dim, cap) + 1, step):
        if dim % c == 0:
            best = c
    return best


def _pick_thw(hw):
    """HW tile (multiple of 16, <=4096) dividing hw; whole sample as fallback."""
    best = None
    for c in range(16, min(hw, 4096) + 1, 16):
        if hw % c == 0:
            best = c
    return best if best is not None else hw


def _vmem_limit_bytes():
    # v5e/v6e: 128 MiB physical VMEM -> allow ~96 MiB; v7x: 64 MiB -> ~44 MiB.
    try:
        cap = getattr(pltpu.get_tpu_info(), "vmem_capacity_bytes", None)
    except Exception:
        cap = None
    if cap is None:
        return 32 * 1024 * 1024
    if cap >= 100 * 1024 * 1024:
        return 96 * 1024 * 1024
    return 44 * 1024 * 1024


def _is_v5e():
    try:
        kind = jax.devices()[0].device_kind.lower()
    except Exception:
        return False
    return ("v5e" in kind) or ("v5 lite" in kind) or ("v5lite" in kind)


# ---------------------------------------------------------------------------
# Kernel 1: tiled GEMM (im2col conv) with K-reduction accumulator + bias fuse
# ---------------------------------------------------------------------------
def _gemm_bias_kernel(x_ref, w_ref, b_ref, o_ref, acc_ref):
    @pl.when(pl.program_id(2) == 0)
    def _init():
        acc_ref[...] = jnp.zeros_like(acc_ref)

    acc_ref[...] += jnp.dot(x_ref[...], w_ref[...],
                            preferred_element_type=jnp.float32)

    @pl.when(pl.program_id(2) == pl.num_programs(2) - 1)
    def _finalize():
        o_ref[...] = (acc_ref[...] + b_ref[...]).astype(o_ref.dtype)


def conv3x3_bias_pallas(x_nhwc, w_oihw, bias, cp_out):
    """3x3 / stride-1 / pad-1 conv + bias as a tiled im2col GEMM.

    bf16 operands, f32 VMEM accumulator, bf16 output with the channel axis
    padded to `cp_out` lanes.  The row tile divides M = N*H*W exactly so the
    (M, Cp) output reshapes to (N, HW, Cp) for free (no inter-stage padding).
    """
    N, H, W = x_nhwc.shape[:3]
    Cout, Cin = w_oihw.shape[:2]
    M = N * H * W
    K = 9 * Cin
    Kp = _round_up(K, 128)
    Cp = cp_out

    # Wrapper-side im2col in bf16 (acceptable for conv1's tiny Cin; see
    # TODO(synk) in the module header for the conv2 in-kernel tap expansion).
    xb = x_nhwc[..., :Cin].astype(jnp.bfloat16)
    xp = jnp.pad(xb, ((0, 0), (1, 1), (1, 1), (0, 0)))
    cols = [xp[:, dh:dh + H, dw:dw + W, :] for dh in range(3) for dw in range(3)]
    patches = jnp.stack(cols, axis=3).reshape(M, K)
    patches = jnp.pad(patches, ((0, 0), (0, Kp - K)))

    w_mat = jnp.transpose(w_oihw, (2, 3, 1, 0)).reshape(K, Cout)
    w_mat = jnp.pad(w_mat, ((0, Kp - K), (0, Cp - Cout))).astype(jnp.bfloat16)
    b_row = jnp.pad(bias, (0, Cp - Cout)).astype(jnp.float32).reshape(1, Cp)

    tm = _pick_tm(M)
    tk = _pick_div_tile(Kp, 1024)
    tn = _pick_div_tile(Cp, 512)
    grid = (M // tm, Cp // tn, Kp // tk)

    def _lhs_index(i, j, k):
        return (i, k)

    if _is_v5e():
        # Extra LHS buffering hides the exposed patches DMA on v5e's lower HBM BW.
        try:
            lhs_spec = pl.BlockSpec((tm, tk), _lhs_index,
                                    pipeline_mode=pl.Buffered(3))
        except Exception:
            lhs_spec = pl.BlockSpec((tm, tk), _lhs_index)
    else:
        lhs_spec = pl.BlockSpec((tm, tk), _lhs_index)

    cost = pl.CostEstimate(
        flops=2 * M * Kp * Cp,
        transcendentals=0,
        bytes_accessed=M * Kp * 2 + Kp * Cp * 2 + Cp * 4 + M * Cp * 2)

    out = pl.pallas_call(
        _gemm_bias_kernel,
        out_shape=jax.ShapeDtypeStruct((M, Cp), jnp.bfloat16),
        grid=grid,
        in_specs=[
            lhs_spec,
            pl.BlockSpec((tk, tn), lambda i, j, k: (k, j)),
            pl.BlockSpec((1, tn), lambda i, j, k: (0, j)),
        ],
        out_specs=pl.BlockSpec((tm, tn), lambda i, j, k: (i, j)),
        scratch_shapes=[pltpu.VMEM((tm, tn), jnp.float32)],
        compiler_params=pltpu.CompilerParams(
            dimension_semantics=("parallel", "parallel", "arbitrary"),
            vmem_limit_bytes=_vmem_limit_bytes()),
        cost_estimate=cost,
    )(patches, w_mat, b_row)
    return out  # (M, Cp) bf16


# ---------------------------------------------------------------------------
# Kernel 2a: per-sample channel sum / sum-of-squares, accumulated over HW tiles
# ---------------------------------------------------------------------------
def _gn_stats_kernel(y_ref, s_ref):
    x = y_ref[0].astype(jnp.float32)                    # (thw, Cp)
    s1 = jnp.sum(x, axis=0, keepdims=True)              # (1, Cp)
    s2 = jnp.sum(x * x, axis=0, keepdims=True)          # (1, Cp)
    row = lax.broadcasted_iota(jnp.int32, (8, x.shape[1]), 0)
    blk = jnp.where(row == 0, s1, 0.0) + jnp.where(row == 1, s2, 0.0)  # (8, Cp)

    @pl.when(pl.program_id(1) == 0)
    def _first():
        s_ref[0] = blk

    @pl.when(pl.program_id(1) > 0)
    def _rest():
        s_ref[0] += blk


# ---------------------------------------------------------------------------
# Kernel 2b: normalize + affine + ELU per HW tile (group-mean via tiny matmul)
# ---------------------------------------------------------------------------
def _gn_elu_kernel(y_ref, s_ref, p_ref, g_ref, b_ref, o_ref):
    stats = s_ref[0]                                    # (8, Cp): rows 0/1 = sum / sumsq
    gs = jnp.dot(stats, p_ref[...], preferred_element_type=jnp.float32)  # group means
    mean = gs[0:1, :]                                   # (1, Cp)  E[x]   per group
    msq = gs[1:2, :]                                    # (1, Cp)  E[x^2] per group
    var = jnp.maximum(msq - mean * mean, 0.0)           # clamp: avoid rsqrt of <0
    inv = lax.rsqrt(var + GN_EPS)
    scale = g_ref[...] * inv                            # (1, Cp)
    shift = b_ref[...] - mean * scale                   # (1, Cp)

    x = y_ref[0].astype(jnp.float32)                    # (thw, Cp)
    out = x * scale + shift
    # ELU(alpha=1).  exp(min(x,0))-1 kept (guaranteed Mosaic lowering path);
    # expm1 would be marginally more accurate near 0 (diff ~1e-7, below tol).
    out = jnp.where(out > 0.0, out, jnp.exp(jnp.minimum(out, 0.0)) - 1.0)
    o_ref[0] = out.astype(o_ref.dtype)


def groupnorm_elu_pallas(y_flat, N, H, W, Cp, Cout, gamma, beta, num_groups):
    """GroupNorm (biased var, eps=1e-5, affine) + ELU on a (N*HW, Cp) bf16 tensor."""
    HW = H * W
    Cg = Cout // num_groups
    y = y_flat.reshape(N, HW, Cp)                       # free: splits the leading dim
    thw = _pick_thw(HW)
    n_hw = HW // thw
    vmem = _vmem_limit_bytes()

    stats_cost = pl.CostEstimate(
        flops=3 * N * HW * Cp,
        transcendentals=0,
        bytes_accessed=N * HW * Cp * 2 + N * 8 * Cp * 4)

    stats = pl.pallas_call(
        _gn_stats_kernel,
        out_shape=jax.ShapeDtypeStruct((N, 8, Cp), jnp.float32),
        grid=(N, n_hw),
        in_specs=[pl.BlockSpec((1, thw, Cp), lambda n, j: (n, j, 0))],
        out_specs=pl.BlockSpec((1, 8, Cp), lambda n, j: (n, 0, 0)),
        compiler_params=pltpu.CompilerParams(
            dimension_semantics=("parallel", "arbitrary"),
            vmem_limit_bytes=vmem),
        cost_estimate=stats_cost,
    )(y)

    # Group-mean projection: P[c, c'] = 1/(HW*Cg) iff c, c' are real channels
    # of the same group; padded channels project to zero.
    ch = np.arange(Cp)
    grp = np.where(ch < Cout, ch // Cg, -1)
    P = ((grp[:, None] == grp[None, :]) & (grp[:, None] >= 0)).astype(np.float32)
    P = jnp.asarray(P / float(HW * Cg))

    gamma_p = jnp.pad(gamma, (0, Cp - Cout)).astype(jnp.float32).reshape(1, Cp)
    beta_p = jnp.pad(beta, (0, Cp - Cout)).astype(jnp.float32).reshape(1, Cp)

    elu_cost = pl.CostEstimate(
        flops=6 * N * HW * Cp,
        transcendentals=N * HW * Cp,
        bytes_accessed=2 * N * HW * Cp * 2 + N * 8 * Cp * 4 + Cp * Cp * 4 + 2 * Cp * 4)

    out = pl.pallas_call(
        _gn_elu_kernel,
        out_shape=jax.ShapeDtypeStruct((N, HW, Cp), jnp.bfloat16),
        grid=(N, n_hw),
        in_specs=[
            pl.BlockSpec((1, thw, Cp), lambda n, j: (n, j, 0)),
            pl.BlockSpec((1, 8, Cp), lambda n, j: (n, 0, 0)),
            pl.BlockSpec((Cp, Cp), lambda n, j: (0, 0)),
            pl.BlockSpec((1, Cp), lambda n, j: (0, 0)),
            pl.BlockSpec((1, Cp), lambda n, j: (0, 0)),
        ],
        out_specs=pl.BlockSpec((1, thw, Cp), lambda n, j: (n, j, 0)),
        compiler_params=pltpu.CompilerParams(
            dimension_semantics=("parallel", "parallel"),
            vmem_limit_bytes=vmem),
        cost_estimate=elu_cost,
    )(y, stats, P, gamma_p, beta_p)
    return out  # (N, HW, Cp) bf16


# ---------------------------------------------------------------------------
# inconv forward (Pallas) and pure-JAX reference
# ---------------------------------------------------------------------------
def inconv_forward(params, x_nchw):
    N, _, H, W = x_nchw.shape
    out_ch = params["conv1_w"].shape[0]
    G = params["num_groups"]
    Cp = _round_up(out_ch, 128)

    x = jnp.transpose(x_nchw, (0, 2, 3, 1))             # NCHW -> NHWC (module input)

    # conv1 -> GN1 -> ELU
    y1 = conv3x3_bias_pallas(x, params["conv1_w"], params["conv1_b"], Cp)
    a1 = groupnorm_elu_pallas(y1, N, H, W, Cp, out_ch,
                              params["gn1_gamma"], params["gn1_beta"], G)

    # conv2 -> GN2 -> ELU (activation stays lane-padded bf16 between stages;
    # the channel slice inside the conv wrapper fuses into the patches build)
    a1_nhwc = a1.reshape(N, H, W, Cp)
    y2 = conv3x3_bias_pallas(a1_nhwc, params["conv2_w"], params["conv2_b"], Cp)
    a2 = groupnorm_elu_pallas(y2, N, H, W, Cp, out_ch,
                              params["gn2_gamma"], params["gn2_beta"], G)

    # Single channel slice + layout change at the module boundary only.
    out = a2.reshape(N, H, W, Cp)[..., :out_ch]
    return jnp.transpose(out, (0, 3, 1, 2)).astype(jnp.float32)


def conv3x3_bias_ref(x_nhwc, w_oihw, bias):
    out = lax.conv_general_dilated(
        x_nhwc.astype(jnp.bfloat16),
        jnp.transpose(w_oihw, (2, 3, 1, 0)).astype(jnp.bfloat16),
        window_strides=(1, 1), padding=((1, 1), (1, 1)),
        dimension_numbers=("NHWC", "HWIO", "NHWC"),
        preferred_element_type=jnp.float32)
    return out + bias[None, None, None, :]


def groupnorm_elu_ref(y, gamma, beta, num_groups):
    N, H, W, C = y.shape
    Cg = C // num_groups
    yg = y.reshape(N, H * W, num_groups, Cg)
    mean = jnp.mean(yg, axis=(1, 3), keepdims=True)
    var = jnp.mean(jnp.square(yg - mean), axis=(1, 3), keepdims=True)
    yn = ((yg - mean) / jnp.sqrt(var + GN_EPS)).reshape(N, H, W, C)
    yn = yn * gamma[None, None, None, :] + beta[None, None, None, :]
    return jnp.where(yn > 0.0, yn, jnp.exp(jnp.minimum(yn, 0.0)) - 1.0)


def inconv_ref(params, x_nchw):
    x = jnp.transpose(x_nchw, (0, 2, 3, 1))
    for i in ("1", "2"):
        y = conv3x3_bias_ref(x, params[f"conv{i}_w"], params[f"conv{i}_b"])
        x = groupnorm_elu_ref(y, params[f"gn{i}_gamma"], params[f"gn{i}_beta"],
                              params["num_groups"])
    return jnp.transpose(x, (0, 3, 1, 2))


# ---------------------------------------------------------------------------
# Deterministic parameter construction (mirrors inconv/double_conv defaults)
# ---------------------------------------------------------------------------
def build_inconv_params(key, in_ch, out_ch):
    assert out_ch % 8 == 0, "GroupNorm uses num_groups = out_ch // 8"
    ks = jax.random.split(key, 8)

    def conv_init(kw_, kb_, cout, cin, ksz):
        bound = 1.0 / math.sqrt(cin * ksz * ksz)
        w = jax.random.uniform(kw_, (cout, cin, ksz, ksz), jnp.float32, -bound, bound)
        b = jax.random.uniform(kb_, (cout,), jnp.float32, -bound, bound)
        return w, b

    w1, b1 = conv_init(ks[0], ks[1], out_ch, in_ch, 3)
    w2, b2 = conv_init(ks[2], ks[3], out_ch, out_ch, 3)
    return {
        "conv1_w": w1, "conv1_b": b1,
        "conv2_w": w2, "conv2_b": b2,
        # GroupNorm affine params (default init is gamma=1, beta=0; perturbed
        # here to exercise the affine path, forward semantics unchanged).
        "gn1_gamma": 1.0 + 0.1 * jax.random.normal(ks[4], (out_ch,), jnp.float32),
        "gn1_beta": 0.1 * jax.random.normal(ks[5], (out_ch,), jnp.float32),
        "gn2_gamma": 1.0 + 0.1 * jax.random.normal(ks[6], (out_ch,), jnp.float32),
        "gn2_beta": 0.1 * jax.random.normal(ks[7], (out_ch,), jnp.float32),
        "num_groups": out_ch // 8,
    }


# ---------------------------------------------------------------------------
if __name__ == "__main__":
    key = jax.random.PRNGKey(0)
    in_ch, out_ch = 4, 32
    params = build_inconv_params(jax.random.fold_in(key, 1), in_ch, out_ch)
    x = jax.random.normal(jax.random.fold_in(key, 2), (2, in_ch, 16, 16), jnp.float32)

    fwd = jax.jit(partial(inconv_forward, params))
    out = jax.block_until_ready(fwd(x))
    assert out.shape == (2, out_ch, 16, 16), out.shape

    ref = jax.jit(partial(inconv_ref, params))(x)
    np.testing.assert_allclose(np.asarray(out), np.asarray(ref), rtol=3e-2, atol=3e-2)

    print("KERNEL_OK")
</pallas_src>

<mosaic_0001>
module attributes {stable_mosaic.version = 11 : i64} {
  func.func @_gn_stats_kernel(%arg0: i32, %arg1: i32, %arg2: memref<1x256x128xbf16, #tpu.memory_space<vmem>>, %arg3: memref<1x8x128xf32, #tpu.memory_space<vmem>>) attributes {dimension_semantics = [#tpu.dimension_semantics<parallel>, #tpu.dimension_semantics<arbitrary>], iteration_bounds = array<i64: 2, 1>, scalar_prefetch = 0 : i64, scratch_operands = 0 : i64, tpu.core_type = #tpu.core_type<tc>, window_params = [{transform_indices = @transform_0, window_bounds = array<i64: 1, 256, 128>}, {transform_indices = @transform_1, window_bounds = array<i64: 1, 8, 128>}]} {
    %c0 = arith.constant 0 : index
    %c0_0 = arith.constant 0 : index
    %c0_1 = arith.constant 0 : index
    %0 = vector.load %arg2[%c0, %c0_0, %c0_1] : memref<1x256x128xbf16, #tpu.memory_space<vmem>>, vector<1x256x128xbf16>
    %1 = vector.shape_cast %0 : vector<1x256x128xbf16> to vector<256x128xbf16>
    %2 = arith.extf %1 : vector<256x128xbf16> to vector<256x128xf32>
    %cst = arith.constant dense<0.000000e+00> : vector<128xf32>
    %3 = vector.multi_reduction <add>, %2, %cst [0] : vector<256x128xf32> to vector<128xf32>
    %4 = vector.shape_cast %3 : vector<128xf32> to vector<1x128xf32>
    %5 = arith.mulf %2, %2 : vector<256x128xf32>
    %cst_2 = arith.constant dense<0.000000e+00> : vector<128xf32>
    %6 = vector.multi_reduction <add>, %5, %cst_2 [0] : vector<256x128xf32> to vector<128xf32>
    %7 = vector.shape_cast %6 : vector<128xf32> to vector<1x128xf32>
    %8 = tpu.iota {dimensions = array<i32: 0>} : vector<8x128xi32>
    %c0_i32 = arith.constant 0 : i32
    %9 = vector.broadcast %c0_i32 : i32 to vector<8x128xi32>
    %10 = arith.cmpi eq, %8, %9 : vector<8x128xi32>
    %cst_3 = arith.constant 0.000000e+00 : f32
    %11 = vector.shape_cast %4 : vector<1x128xf32> to vector<1x128xf32>
    %12 = vector.broadcast %11 : vector<1x128xf32> to vector<8x128xf32>
    %13 = vector.broadcast %cst_3 : f32 to vector<8x128xf32>
    %14 = arith.select %10, %12, %13 : vector<8x128xi1>, vector<8x128xf32>
    %c1_i32 = arith.constant 1 : i32
    %15 = vector.broadcast %c1_i32 : i32 to vector<8x128xi32>
    %16 = arith.cmpi eq, %8, %15 : vector<8x128xi32>
    %cst_4 = arith.constant 0.000000e+00 : f32
    %17 = vector.shape_cast %7 : vector<1x128xf32> to vector<1x128xf32>
    %18 = vector.broadcast %17 : vector<1x128xf32> to vector<8x128xf32>
    %19 = vector.broadcast %cst_4 : f32 to vector<8x128xf32>
    %20 = arith.select %16, %18, %19 : vector<8x128xi1>, vector<8x128xf32>
    %21 = arith.addf %14, %20 : vector<8x128xf32>
    %c0_i32_5 = arith.constant 0 : i32
    %22 = arith.cmpi eq, %arg1, %c0_i32_5 : i32
    %23 = arith.extui %22 : i1 to i32
    %c0_i32_6 = arith.constant 0 : i32
    %24 = arith.cmpi ne, %23, %c0_i32_6 : i32
    scf.if %24 {
      %c0_9 = arith.constant 0 : index
      %c0_10 = arith.constant 0 : index
      %c0_11 = arith.constant 0 : index
      %28 = vector.load %arg3[%c0_9, %c0_10, %c0_11] : memref<1x8x128xf32, #tpu.memory_space<vmem>>, vector<1x8x128xf32>
      %29 = vector.shape_cast %28 : vector<1x8x128xf32> to vector<8x128xf32>
      %30 = vector.shape_cast %21 : vector<8x128xf32> to vector<1x8x128xf32>
      tpu.vector_store %arg3[%c0_9, %c0_10, %c0_11], %30 {strides = array<i32>} : memref<1x8x128xf32, #tpu.memory_space<vmem>>, vector<1x8x128xf32>,
    } else {
    }
    %c0_i32_7 = arith.constant 0 : i32
    %25 = arith.cmpi sgt, %arg1, %c0_i32_7 : i32
    %26 = arith.extui %25 : i1 to i32
    %c0_i32_8 = arith.constant 0 : i32
    %27 = arith.cmpi ne, %26, %c0_i32_8 : i32
    scf.if %27 {
      %c0_9 = arith.constant 0 : index
      %c0_10 = arith.constant 0 : index
      %c0_11 = arith.constant 0 : index
      %28 = vector.load %arg3[%c0_9, %c0_10, %c0_11] : memref<1x8x128xf32, #tpu.memory_space<vmem>>, vector<1x8x128xf32>
      %29 = vector.shape_cast %28 : vector<1x8x128xf32> to vector<8x128xf32>
      %30 = arith.addf %29, %21 : vector<8x128xf32>
      %c0_12 = arith.constant 0 : index
      %c0_13 = arith.constant 0 : index
      %c0_14 = arith.constant 0 : index
      %31 = vector.load %arg3[%c0_12, %c0_13, %c0_14] : memref<1x8x128xf32, #tpu.memory_space<vmem>>, vector<1x8x128xf32>
      %32 = vector.shape_cast %31 : vector<1x8x128xf32> to vector<8x128xf32>
      %33 = vector.shape_cast %30 : vector<8x128xf32> to vector<1x8x128xf32>
      tpu.vector_store %arg3[%c0_12, %c0_13, %c0_14], %33 {strides = array<i32>} : memref<1x8x128xf32, #tpu.memory_space<vmem>>, vector<1x8x128xf32>,
    } else {
    }
    return
  }
  func.func @transform_0(%arg0: i32, %arg1: i32) -> (i32, i32, i32) {
    %c0_i32 = arith.constant 0 : i32
    %c0_i32_0 = arith.constant 0 : i32
    return %arg0, %arg1, %c0_i32 : i32, i32, i32
  }
  func.func @transform_1(%arg0: i32, %arg1: i32) -> (i32, i32, i32) {
    %c0_i32 = arith.constant 0 : i32
    %c0_i32_0 = arith.constant 0 : i32
    %c0_i32_1 = arith.constant 0 : i32
    return %arg0, %c0_i32, %c0_i32_0 : i32, i32, i32
  }
}

module attributes {stable_mosaic.version = 11 : i64} {
  func.func @_gemm_bias_kernel(%arg0: i32, %arg1: i32, %arg2: i32, %arg3: memref<256x128xbf16, #tpu.memory_space<vmem>>, %arg4: memref<128x128xbf16, #tpu.memory_space<vmem>>, %arg5: memref<1x128xf32, #tpu.memory_space<vmem>>, %arg6: memref<256x128xbf16, #tpu.memory_space<vmem>>, %arg7: memref<256x128xf32, #tpu.memory_space<vmem>>) attributes {dimension_semantics = [#tpu.dimension_semantics<parallel>, #tpu.dimension_semantics<parallel>, #tpu.dimension_semantics<arbitrary>], iteration_bounds = array<i64: 2, 1, 1>, scalar_prefetch = 0 : i64, scratch_operands = 1 : i64, tpu.core_type = #tpu.core_type<tc>, window_params = [{transform_indices = @transform_0, window_bounds = array<i64: 256, 128>}, {transform_indices = @transform_1, window_bounds = array<i64: 128, 128>}, {transform_indices = @transform_2, window_bounds = array<i64: 1, 128>}, {transform_indices = @transform_3, window_bounds = array<i64: 256, 128>}]} {
    %c0_i32 = arith.constant 0 : i32
    %0 = arith.cmpi eq, %arg2, %c0_i32 : i32
    %1 = arith.extui %0 : i1 to i32
    %c0_i32_0 = arith.constant 0 : i32
    %2 = arith.cmpi ne, %1, %c0_i32_0 : i32
    scf.if %2 {
      %cst_10 = arith.constant 0.000000e+00 : f32
      %12 = vector.broadcast %cst_10 : f32 to vector<256x128xf32>
      %c0_11 = arith.constant 0 : index
      %c0_12 = arith.constant 0 : index
      %13 = vector.load %arg7[%c0_11, %c0_12] : memref<256x128xf32, #tpu.memory_space<vmem>>, vector<256x128xf32>
      tpu.vector_store %arg7[%c0_11, %c0_12], %12 {strides = array<i32>} : memref<256x128xf32, #tpu.memory_space<vmem>>, vector<256x128xf32>,
    } else {
    }
    %c0 = arith.constant 0 : index
    %c0_1 = arith.constant 0 : index
    %3 = vector.load %arg7[%c0, %c0_1] : memref<256x128xf32, #tpu.memory_space<vmem>>, vector<256x128xf32>
    %c0_2 = arith.constant 0 : index
    %c0_3 = arith.constant 0 : index
    %4 = vector.load %arg3[%c0_2, %c0_3] : memref<256x128xbf16, #tpu.memory_space<vmem>>, vector<256x128xbf16>
    %c0_4 = arith.constant 0 : index
    %c0_5 = arith.constant 0 : index
    %5 = vector.load %arg4[%c0_4, %c0_5] : memref<128x128xbf16, #tpu.memory_space<vmem>>, vector<128x128xbf16>
    %cst = arith.constant dense<0.000000e+00> : vector<256x128xf32>
    %6 = tpu.matmul %4, %5, %cst {dimension_numbers = #tpu.dot_dimension_numbers<[1], [0], [0], [1], [0, 0, 1, 1], [], []>} : vector<256x128xbf16>, vector<128x128xbf16>, vector<256x128xf32> -> vector<256x128xf32>
    %7 = arith.addf %3, %6 : vector<256x128xf32>
    %c0_6 = arith.constant 0 : index
    %c0_7 = arith.constant 0 : index
    %8 = vector.load %arg7[%c0_6, %c0_7] : memref<256x128xf32, #tpu.memory_space<vmem>>, vector<256x128xf32>
    tpu.vector_store %arg7[%c0_6, %c0_7], %7 {strides = array<i32>} : memref<256x128xf32, #tpu.memory_space<vmem>>, vector<256x128xf32>,
    %c0_i32_8 = arith.constant 0 : i32
    %9 = arith.cmpi eq, %arg2, %c0_i32_8 : i32
    %10 = arith.extui %9 : i1 to i32
    %c0_i32_9 = arith.constant 0 : i32
    %11 = arith.cmpi ne, %10, %c0_i32_9 : i32
    scf.if %11 {
      %c0_10 = arith.constant 0 : index
      %c0_11 = arith.constant 0 : index
      %12 = vector.load %arg7[%c0_10, %c0_11] : memref<256x128xf32, #tpu.memory_space<vmem>>, vector<256x128xf32>
      %c0_12 = arith.constant 0 : index
      %c0_13 = arith.constant 0 : index
      %13 = vector.load %arg5[%c0_12, %c0_13] : memref<1x128xf32, #tpu.memory_space<vmem>>, vector<1x128xf32>
      %14 = vector.broadcast %13 : vector<1x128xf32> to vector<256x128xf32>
      %15 = arith.addf %12, %14 : vector<256x128xf32>
      %16 = arith.truncf %15 : vector<256x128xf32> to vector<256x128xbf16>
      %c0_14 = arith.constant 0 : index
      %c0_15 = arith.constant 0 : index
      %17 = vector.load %arg6[%c0_14, %c0_15] : memref<256x128xbf16, #tpu.memory_space<vmem>>, vector<256x128xbf16>
      tpu.vector_store %arg6[%c0_14, %c0_15], %16 {strides = array<i32>} : memref<256x128xbf16, #tpu.memory_space<vmem>>, vector<256x128xbf16>,
    } else {
    }
    return
  }
  func.func @transform_0(%arg0: i32, %arg1: i32, %arg2: i32) -> (i32, i32) {
    %c0_i32 = arith.constant 0 : i32
    return %arg0, %arg2 : i32, i32
  }
  func.func @transform_1(%arg0: i32, %arg1: i32, %arg2: i32) -> (i32, i32) {
    %c0_i32 = arith.constant 0 : i32
    return %arg2, %arg1 : i32, i32
  }
  func.func @transform_2(%arg0: i32, %arg1: i32, %arg2: i32) -> (i32, i32) {
    %c0_i32 = arith.constant 0 : i32
    %c0_i32_0 = arith.constant 0 : i32
    return %c0_i32, %arg1 : i32, i32
  }
  func.func @transform_3(%arg0: i32, %arg1: i32, %arg2: i32) -> (i32, i32) {
    %c0_i32 = arith.constant 0 : i32
    return %arg0, %arg1 : i32, i32
  }
}

module attributes {stable_mosaic.version = 11 : i64} {
  func.func @_gn_elu_kernel(%arg0: i32, %arg1: i32, %arg2: memref<1x256x128xbf16, #tpu.memory_space<vmem>>, %arg3: memref<1x8x128xf32, #tpu.memory_space<vmem>>, %arg4: memref<128x128xf32, #tpu.memory_space<vmem>>, %arg5: memref<1x128xf32, #tpu.memory_space<vmem>>, %arg6: memref<1x128xf32, #tpu.memory_space<vmem>>, %arg7: memref<1x256x128xbf16, #tpu.memory_space<vmem>>) attributes {dimension_semantics = [#tpu.dimension_semantics<parallel>, #tpu.dimension_semantics<parallel>], iteration_bounds = array<i64: 2, 1>, scalar_prefetch = 0 : i64, scratch_operands = 0 : i64, tpu.core_type = #tpu.core_type<tc>, window_params = [{transform_indices = @transform_0, window_bounds = array<i64: 1, 256, 128>}, {transform_indices = @transform_1, window_bounds = array<i64: 1, 8, 128>}, {pipeline_mode = #tpu.pipeline_mode<synchronous>, transform_indices = @transform_2, window_bounds = array<i64: 128, 128>}, {pipeline_mode = #tpu.pipeline_mode<synchronous>, transform_indices = @transform_3, window_bounds = array<i64: 1, 128>}, {pipeline_mode = #tpu.pipeline_mode<synchronous>, transform_indices = @transform_4, window_bounds = array<i64: 1, 128>}, {transform_indices = @transform_5, window_bounds = array<i64: 1, 256, 128>}]} {
    %c0 = arith.constant 0 : index
    %c0_0 = arith.constant 0 : index
    %c0_1 = arith.constant 0 : index
    %0 = vector.load %arg3[%c0, %c0_0, %c0_1] : memref<1x8x128xf32, #tpu.memory_space<vmem>>, vector<1x8x128xf32>
    %1 = vector.shape_cast %0 : vector<1x8x128xf32> to vector<8x128xf32>
    %c0_2 = arith.constant 0 : index
    %c0_3 = arith.constant 0 : index
    %2 = vector.load %arg4[%c0_2, %c0_3] : memref<128x128xf32, #tpu.memory_space<vmem>>, vector<128x128xf32>
    %cst = arith.constant dense<0.000000e+00> : vector<8x128xf32>
    %3 = tpu.matmul %1, %2, %cst {dimension_numbers = #tpu.dot_dimension_numbers<[1], [0], [0], [1], [0, 0, 1, 1], [], []>} : vector<8x128xf32>, vector<128x128xf32>, vector<8x128xf32> -> vector<8x128xf32>
    %4 = vector.extract_strided_slice %3 {offsets = [0, 0], sizes = [1, 128], strides = [1, 1]} : vector<8x128xf32> to vector<1x128xf32>
    %5 = vector.extract_strided_slice %3 {offsets = [1, 0], sizes = [1, 128], strides = [1, 1]} : vector<8x128xf32> to vector<1x128xf32>
    %6 = arith.mulf %4, %4 : vector<1x128xf32>
    %7 = arith.subf %5, %6 : vector<1x128xf32>
    %cst_4 = arith.constant 0.000000e+00 : f32
    %8 = vector.broadcast %cst_4 : f32 to vector<1x128xf32>
    %9 = arith.maximumf %7, %8 : vector<1x128xf32>
    %cst_5 = arith.constant 9.99999974E-6 : f32
    %10 = vector.broadcast %cst_5 : f32 to vector<1x128xf32>
    %11 = arith.addf %9, %10 : vector<1x128xf32>
    %12 = math.rsqrt %11 : vector<1x128xf32>
    %c0_6 = arith.constant 0 : index
    %c0_7 = arith.constant 0 : index
    %13 = vector.load %arg5[%c0_6, %c0_7] : memref<1x128xf32, #tpu.memory_space<vmem>>, vector<1x128xf32>
    %14 = arith.mulf %13, %12 : vector<1x128xf32>
    %c0_8 = arith.constant 0 : index
    %c0_9 = arith.constant 0 : index
    %15 = vector.load %arg6[%c0_8, %c0_9] : memref<1x128xf32, #tpu.memory_space<vmem>>, vector<1x128xf32>
    %16 = arith.mulf %4, %14 : vector<1x128xf32>
    %17 = arith.subf %15, %16 : vector<1x128xf32>
    %c0_10 = arith.constant 0 : index
    %c0_11 = arith.constant 0 : index
    %c0_12 = arith.constant 0 : index
    %18 = vector.load %arg2[%c0_10, %c0_11, %c0_12] : memref<1x256x128xbf16, #tpu.memory_space<vmem>>, vector<1x256x128xbf16>
    %19 = vector.shape_cast %18 : vector<1x256x128xbf16> to vector<256x128xbf16>
    %20 = arith.extf %19 : vector<256x128xbf16> to vector<256x128xf32>
    %21 = vector.broadcast %14 : vector<1x128xf32> to vector<256x128xf32>
    %22 = arith.mulf %20, %21 : vector<256x128xf32>
    %23 = vector.broadcast %17 : vector<1x128xf32> to vector<256x128xf32>
    %24 = arith.addf %22, %23 : vector<256x128xf32>
    %cst_13 = arith.constant 0.000000e+00 : f32
    %25 = vector.broadcast %cst_13 : f32 to vector<256x128xf32>
    %26 = arith.cmpf ogt, %24, %25 : vector<256x128xf32>
    %cst_14 = arith.constant 0.000000e+00 : f32
    %27 = vector.broadcast %cst_14 : f32 to vector<256x128xf32>
    %28 = arith.minimumf %24, %27 : vector<256x128xf32>
    %29 = math.exp %28 : vector<256x128xf32>
    %cst_15 = arith.constant 1.000000e+00 : f32
    %30 = vector.broadcast %cst_15 : f32 to vector<256x128xf32>
    %31 = arith.subf %29, %30 : vector<256x128xf32>
    %32 = arith.select %26, %24, %31 : vector<256x128xi1>, vector<256x128xf32>
    %33 = arith.truncf %32 : vector<256x128xf32> to vector<256x128xbf16>
    %c0_16 = arith.constant 0 : index
    %c0_17 = arith.constant 0 : index
    %c0_18 = arith.constant 0 : index
    %34 = vector.load %arg7[%c0_16, %c0_17, %c0_18] : memref<1x256x128xbf16, #tpu.memory_space<vmem>>, vector<1x256x128xbf16>
    %35 = vector.shape_cast %34 : vector<1x256x128xbf16> to vector<256x128xbf16>
    %36 = vector.shape_cast %33 : vector<256x128xbf16> to vector<1x256x128xbf16>
    tpu.vector_store %arg7[%c0_16, %c0_17, %c0_18], %36 {strides = array<i32>} : memref<1x256x128xbf16, #tpu.memory_space<vmem>>, vector<1x256x128xbf16>,
    return
  }
  func.func @transform_0(%arg0: i32, %arg1: i32) -> (i32, i32, i32) {
    %c0_i32 = arith.constant 0 : i32
    %c0_i32_0 = arith.constant 0 : i32
    return %arg0, %arg1, %c0_i32 : i32, i32, i32
  }
  func.func @transform_1(%arg0: i32, %arg1: i32) -> (i32, i32, i32) {
    %c0_i32 = arith.constant 0 : i32
    %c0_i32_0 = arith.constant 0 : i32
    %c0_i32_1 = arith.constant 0 : i32
    return %arg0, %c0_i32, %c0_i32_0 : i32, i32, i32
  }
  func.func @transform_2(%arg0: i32, %arg1: i32) -> (i32, i32) {
    %c0_i32 = arith.constant 0 : i32
    %c0_i32_0 = arith.constant 0 : i32
    %c0_i32_1 = arith.constant 0 : i32
    return %c0_i32, %c0_i32_0 : i32, i32
  }
  func.func @transform_3(%arg0: i32, %arg1: i32) -> (i32, i32) {
    %c0_i32 = arith.constant 0 : i32
    %c0_i32_0 = arith.constant 0 : i32
    %c0_i32_1 = arith.constant 0 : i32
    return %c0_i32, %c0_i32_0 : i32, i32
  }
  func.func @transform_4(%arg0: i32, %arg1: i32) -> (i32, i32) {
    %c0_i32 = arith.constant 0 : i32
    %c0_i32_0 = arith.constant 0 : i32
    %c0_i32_1 = arith.constant 0 : i32
    return %c0_i32, %c0_i32_0 : i32, i32
  }
  func.func @transform_5(%arg0: i32, %arg1: i32) -> (i32, i32, i32) {
    %c0_i32 = arith.constant 0 : i32
    %c0_i32_0 = arith.constant 0 : i32
    return %arg0, %arg1, %c0_i32 : i32, i32, i32
  }
}

module attributes {stable_mosaic.version = 11 : i64} {
  func.func @_gemm_bias_kernel(%arg0: i32, %arg1: i32, %arg2: i32, %arg3: memref<256x384xbf16, #tpu.memory_space<vmem>>, %arg4: memref<384x128xbf16, #tpu.memory_space<vmem>>, %arg5: memref<1x128xf32, #tpu.memory_space<vmem>>, %arg6: memref<256x128xbf16, #tpu.memory_space<vmem>>, %arg7: memref<256x128xf32, #tpu.memory_space<vmem>>) attributes {dimension_semantics = [#tpu.dimension_semantics<parallel>, #tpu.dimension_semantics<parallel>, #tpu.dimension_semantics<arbitrary>], iteration_bounds = array<i64: 2, 1, 1>, scalar_prefetch = 0 : i64, scratch_operands = 1 : i64, tpu.core_type = #tpu.core_type<tc>, window_params = [{transform_indices = @transform_0, window_bounds = array<i64: 256, 384>}, {transform_indices = @transform_1, window_bounds = array<i64: 384, 128>}, {transform_indices = @transform_2, window_bounds = array<i64: 1, 128>}, {transform_indices = @transform_3, window_bounds = array<i64: 256, 128>}]} {
    %c0_i32 = arith.constant 0 : i32
    %0 = arith.cmpi eq, %arg2, %c0_i32 : i32
    %1 = arith.extui %0 : i1 to i32
    %c0_i32_0 = arith.constant 0 : i32
    %2 = arith.cmpi ne, %1, %c0_i32_0 : i32
    scf.if %2 {
      %cst_10 = arith.constant 0.000000e+00 : f32
      %12 = vector.broadcast %cst_10 : f32 to vector<256x128xf32>
      %c0_11 = arith.constant 0 : index
      %c0_12 = arith.constant 0 : index
      %13 = vector.load %arg7[%c0_11, %c0_12] : memref<256x128xf32, #tpu.memory_space<vmem>>, vector<256x128xf32>
      tpu.vector_store %arg7[%c0_11, %c0_12], %12 {strides = array<i32>} : memref<256x128xf32, #tpu.memory_space<vmem>>, vector<256x128xf32>,
    } else {
    }
    %c0 = arith.constant 0 : index
    %c0_1 = arith.constant 0 : index
    %3 = vector.load %arg7[%c0, %c0_1] : memref<256x128xf32, #tpu.memory_space<vmem>>, vector<256x128xf32>
    %c0_2 = arith.constant 0 : index
    %c0_3 = arith.constant 0 : index
    %4 = vector.load %arg3[%c0_2, %c0_3] : memref<256x384xbf16, #tpu.memory_space<vmem>>, vector<256x384xbf16>
    %c0_4 = arith.constant 0 : index
    %c0_5 = arith.constant 0 : index
    %5 = vector.load %arg4[%c0_4, %c0_5] : memref<384x128xbf16, #tpu.memory_space<vmem>>, vector<384x128xbf16>
    %cst = arith.constant dense<0.000000e+00> : vector<256x128xf32>
    %6 = tpu.matmul %4, %5, %cst {dimension_numbers = #tpu.dot_dimension_numbers<[1], [0], [0], [1], [0, 0, 1, 1], [], []>} : vector<256x384xbf16>, vector<384x128xbf16>, vector<256x128xf32> -> vector<256x128xf32>
    %7 = arith.addf %3, %6 : vector<256x128xf32>
    %c0_6 = arith.constant 0 : index
    %c0_7 = arith.constant 0 : index
    %8 = vector.load %arg7[%c0_6, %c0_7] : memref<256x128xf32, #tpu.memory_space<vmem>>, vector<256x128xf32>
    tpu.vector_store %arg7[%c0_6, %c0_7], %7 {strides = array<i32>} : memref<256x128xf32, #tpu.memory_space<vmem>>, vector<256x128xf32>,
    %c0_i32_8 = arith.constant 0 : i32
    %9 = arith.cmpi eq, %arg2, %c0_i32_8 : i32
    %10 = arith.extui %9 : i1 to i32
    %c0_i32_9 = arith.constant 0 : i32
    %11 = arith.cmpi ne, %10, %c0_i32_9 : i32
    scf.if %11 {
      %c0_10 = arith.constant 0 : index
      %c0_11 = arith.constant 0 : index
      %12 = vector.load %arg7[%c0_10, %c0_11] : memref<256x128xf32, #tpu.memory_space<vmem>>, vector<256x128xf32>
      %c0_12 = arith.constant 0 : index
      %c0_13 = arith.constant 0 : index
      %13 = vector.load %arg5[%c0_12, %c0_13] : memref<1x128xf32, #tpu.memory_space<vmem>>, vector<1x128xf32>
      %14 = vector.broadcast %13 : vector<1x128xf32> to vector<256x128xf32>
      %15 = arith.addf %12, %14 : vector<256x128xf32>
      %16 = arith.truncf %15 : vector<256x128xf32> to vector<256x128xbf16>
      %c0_14 = arith.constant 0 : index
      %c0_15 = arith.constant 0 : index
      %17 = vector.load %arg6[%c0_14, %c0_15] : memref<256x128xbf16, #tpu.memory_space<vmem>>, vector<256x128xbf16>
      tpu.vector_store %arg6[%c0_14, %c0_15], %16 {strides = array<i32>} : memref<256x128xbf16, #tpu.memory_space<vmem>>, vector<256x128xbf16>,
    } else {
    }
    return
  }
  func.func @transform_0(%arg0: i32, %arg1: i32, %arg2: i32) -> (i32, i32) {
    %c0_i32 = arith.constant 0 : i32
    return %arg0, %arg2 : i32, i32
  }
  func.func @transform_1(%arg0: i32, %arg1: i32, %arg2: i32) -> (i32, i32) {
    %c0_i32 = arith.constant 0 : i32
    return %arg2, %arg1 : i32, i32
  }
  func.func @transform_2(%arg0: i32, %arg1: i32, %arg2: i32) -> (i32, i32) {
    %c0_i32 = arith.constant 0 : i32
    %c0_i32_0 = arith.constant 0 : i32
    return %c0_i32, %arg1 : i32, i32
  }
  func.func @transform_3(%arg0: i32, %arg1: i32, %arg2: i32) -> (i32, i32) {
    %c0_i32 = arith.constant 0 : i32
    return %arg0, %arg1 : i32, i32
  }
}

</mosaic_0001>

<bundles_post_ra>
// kernel: inconv_forward.7
= control target key start
LH: loop header
LB: loop body
LE: loop exit
PB: predicated region body
PF: predicated region fallthrough
CT: control target
= control target key end

     0   :  { %s547_s6 = smov 0   ;;  %s549_s7 = smov 0   ;;  %s602_s0 = inlined_call_operand.vmem [shape: bf16[2,256,128], index: 0, kind: input, shape index: {}]   ;;  %s603_s1 = inlined_call_operand.vmem [shape: f32[2,8,128], index: 1, kind: output, shape index: {}]  }
   0x1   :  { %s551_s8 = smov 0  }
   0x2 LB: > { %s23_s9 = sadd.s32 1, %s531_s7  ;;  %p403_p0 = scmp.ge.s32.totalorder %s535_s8, 1  ;;  %s535_s8 = sphi %s551_s8, %s11_s8   ;;  %s531_s7 = sphi %s549_s7, %s605_s7   ;;  %s527_s6 = sphi %s547_s6, %s604_s6  }
   0x3   : > { %p25_p1 = scmp.ge.s32.totalorder %s23_s9, 2  ;;  %p106_p2 = scmp.lt.s32.totalorder %s535_s8, 3 }
   0x5   : > { %s607_s9 = smov (%p25_p1, %s23_s9), 0  ;;  %p107_p3 = pnand %p403_p0, %p106_p2 }
   0x6   : > { %p130_p4 = scmp.lt.s32.totalorder (!%p107_p3), %s527_s6, 1 }
   0x7   : > { %110 = sbr.rel (%p107_p3) target bundleno = 98 (0x62), region = 24 }
   0xc   : > { %s609_s6 = smov (!%p130_p4, %s527_s6), 1 }
   0xd   : > { %s409_s10 = sshll.u32 %s609_s6, 7  ;;  %s406_s14 = sshll.u32 %s609_s6, 3 }
   0xe   : > { %s571_s13 = scalar_lea.vmem %s602_s0, %s409_s10  ;;  %s142_s17 = scalar_lea.vmem %s603_s1, %s406_s14 }
   0xf   : > { %v411_v0 = vld [vmem:[%s571_s13] sm:$0xff]   ;;  %v474_v1 = vld [vmem:[%s571_s13 + $0x8] sm:$0xff]   ;;  %v475_v6 = vld [vmem:[%s571_s13 + $0x10] sm:$0xff]  }
  0x10   : > { %v412_v2 = vunpack.c.l.bf16 %v411_v0  ;;  %v413_v3 = vunpack.c.h.bf16 %v411_v0  ;;  %v416_v4 = vunpack.c.l.bf16 %v474_v1  ;;  %v417_v7 = vunpack.c.h.bf16 %v474_v1  ;;  %v476_v11 = vld [vmem:[%s571_s13 + $0x18] sm:$0xff]   ;;  %v477_v19 = vld [vmem:[%s571_s13 + $0x20] sm:$0xff]   ;;  %v478_v28 = vld [vmem:[%s571_s13 + $0x28] sm:$0xff]  }
  0x11   : > { %v420_v9 = vunpack.c.l.bf16 %v475_v6  ;;  %v421_v14 = vunpack.c.h.bf16 %v475_v6  ;;  %v424_v17 = vunpack.c.l.bf16 %v476_v11  ;;  %v425_v22 = vunpack.c.h.bf16 %v476_v11  ;;  %v479_v37 = vld [vmem:[%s571_s13 + $0x30] sm:$0xff]   ;;  %v480_v46 = vld [vmem:[%s571_s13 + $0x38] sm:$0xff]   ;;  %v481_v55 = vld [vmem:[%s571_s13 + $0x40] sm:$0xff]  }
  0x12   : > { %v207_v5 = vadd.f32 %v413_v3, %v412_v2  ;;  %v244_v12 = vmul.f32 %v412_v2, %v412_v2  ;;  %v245_v13 = vmul.f32 %v413_v3, %v413_v3  ;;  %v246_v16 = vmul.f32 %v416_v4, %v416_v4  ;;  %v482_v0 = vld [vmem:[%s571_s13 + $0x48] sm:$0xff]  }
  0x13   : > { %v247_v20 = vmul.f32 %v417_v7, %v417_v7  ;;  %v248_v24 = vmul.f32 %v420_v9, %v420_v9  ;;  %v428_v26 = vunpack.c.l.bf16 %v477_v19  ;;  %v249_v29 = vmul.f32 %v421_v14, %v421_v14 }
  0x14   : > { %v208_v8 = vadd.f32 %v416_v4, %v207_v5  ;;  %v276_v21 = vadd.f32 %v245_v13, %v244_v12  ;;  %v429_v31 = vunpack.c.h.bf16 %v477_v19  ;;  %v250_v33 = vmul.f32 %v424_v17, %v424_v17 }
  0x15   : > { %v432_v35 = vunpack.c.l.bf16 %v478_v28  ;;  %v251_v38 = vmul.f32 %v425_v22, %v425_v22  ;;  %v433_v40 = vunpack.c.h.bf16 %v478_v28  ;;  %v252_v42 = vmul.f32 %v428_v26, %v428_v26 }
  0x16   : > { %v209_v10 = vadd.f32 %v417_v7, %v208_v8  ;;  %v277_v25 = vadd.f32 %v276_v21, %v246_v16  ;;  %v436_v44 = vunpack.c.l.bf16 %v479_v37  ;;  %v253_v47 = vmul.f32 %v429_v31, %v429_v31 }
  0x17   : > { %v437_v49 = vunpack.c.h.bf16 %v479_v37  ;;  %v254_v51 = vmul.f32 %v432_v35, %v432_v35  ;;  %v440_v53 = vunpack.c.l.bf16 %v480_v46  ;;  %v255_v56 = vmul.f32 %v433_v40, %v433_v40 }
  0x18   : > { %v210_v15 = vadd.f32 %v420_v9, %v209_v10  ;;  %v278_v30 = vadd.f32 %v277_v25, %v247_v20  ;;  %v441_v58 = vunpack.c.h.bf16 %v480_v46  ;;  %v256_v60 = vmul.f32 %v436_v44, %v436_v44  ;;  %v483_v9 = vld [vmem:[%s571_s13 + $0x50] sm:$0xff]  }
  0x19   : > { %v444_v62 = vunpack.c.l.bf16 %v481_v55  ;;  %v257_v1 = vmul.f32 %v437_v49, %v437_v49  ;;  %v445_v3 = vunpack.c.h.bf16 %v481_v55  ;;  %v258_v5 = vmul.f32 %v440_v53, %v440_v53 }
  0x1a   : > { %v211_v18 = vadd.f32 %v421_v14, %v210_v15  ;;  %v279_v34 = vadd.f32 %v278_v30, %v248_v24  ;;  %v448_v7 = vunpack.c.l.bf16 %v482_v0  ;;  %v259_v10 = vmul.f32 %v441_v58, %v441_v58 }
  0x1b   : > { %v449_v12 = vunpack.c.h.bf16 %v482_v0  ;;  %v260_v14 = vmul.f32 %v444_v62, %v444_v62  ;;  %v452_v16 = vunpack.c.l.bf16 %v483_v9  ;;  %v261_v19 = vmul.f32 %v445_v3, %v445_v3 }
  0x1c   : > { %v212_v23 = vadd.f32 %v424_v17, %v211_v18  ;;  %v280_v39 = vadd.f32 %v279_v34, %v249_v29  ;;  %v484_v18 = vld [vmem:[%s571_s13 + $0x58] sm:$0xff]   ;;  %v453_v21 = vunpack.c.h.bf16 %v483_v9 }
  0x1d   : > { %v456_v25 = vunpack.c.l.bf16 %v484_v18  ;;  %v263_v28 = vmul.f32 %v449_v12, %v449_v12  ;;  %v457_v30 = vunpack.c.h.bf16 %v484_v18  ;;  %v313_v18 = vlaneseq }
  0x1e   : > { %v213_v27 = vadd.f32 %v425_v22, %v212_v23  ;;  %v281_v43 = vadd.f32 %v280_v39, %v250_v33  ;;  %v262_v23 = vmul.f32 %v448_v7, %v448_v7  ;;  %v265_v37 = vmul.f32 %v453_v21, %v453_v21 }
  0x1f   : > { %v267_v46 = vmul.f32 %v457_v30, %v457_v30 }
  0x20   : > { %v214_v32 = vadd.f32 %v428_v26, %v213_v27  ;;  %v282_v48 = vadd.f32 %v281_v43, %v251_v38  ;;  %v485_v27 = vld [vmem:[%s571_s13 + $0x60] sm:$0xff]  }
  0x21   : > { %v460_v34 = vunpack.c.l.bf16 %v485_v27  ;;  %v461_v39 = vunpack.c.h.bf16 %v485_v27 }
  0x22   : > { %v215_v36 = vadd.f32 %v429_v31, %v214_v32  ;;  %v283_v52 = vadd.f32 %v282_v48, %v252_v42  ;;  %v264_v32 = vmul.f32 %v452_v16, %v452_v16 }
  0x23   : > { %v269_v55 = vmul.f32 %v461_v39, %v461_v39 }
  0x24   : > { %v216_v41 = vadd.f32 %v432_v35, %v215_v36  ;;  %v284_v57 = vadd.f32 %v283_v52, %v253_v47  ;;  %v486_v36 = vld [vmem:[%s571_s13 + $0x68] sm:$0xff]  }
  0x25   : > { %v464_v43 = vunpack.c.l.bf16 %v486_v36  ;;  %v465_v48 = vunpack.c.h.bf16 %v486_v36 }
  0x26   : > { %v217_v45 = vadd.f32 %v433_v40, %v216_v41  ;;  %v285_v61 = vadd.f32 %v284_v57, %v254_v51  ;;  %v266_v41 = vmul.f32 %v456_v25, %v456_v25 }
  0x28   : > { %v218_v50 = vadd.f32 %v436_v44, %v217_v45  ;;  %v286_v2 = vadd.f32 %v285_v61, %v255_v56  ;;  %v487_v45 = vld [vmem:[%s571_s13 + $0x70] sm:$0xff]  }
  0x29   : > { %v468_v52 = vunpack.c.l.bf16 %v487_v45  ;;  %v469_v57 = vunpack.c.h.bf16 %v487_v45 }
  0x2a   : > { %v219_v54 = vadd.f32 %v437_v49, %v218_v50  ;;  %v287_v6 = vadd.f32 %v286_v2, %v256_v60  ;;  %v268_v50 = vmul.f32 %v460_v34, %v460_v34 }
  0x2c   : > { %v220_v59 = vadd.f32 %v440_v53, %v219_v54  ;;  %v288_v11 = vadd.f32 %v287_v6, %v257_v1  ;;  %v488_v54 = vld [vmem:[%s571_s13 + $0x78] sm:$0xff]   ;;  %v273_v6 = vmul.f32 %v469_v57, %v469_v57 }
  0x2d   : > { %v472_v61 = vunpack.c.l.bf16 %v488_v54  ;;  %v473_v1 = vunpack.c.h.bf16 %v488_v54 }
  0x2e   : > { %v221_v63 = vadd.f32 %v441_v58, %v220_v59  ;;  %v289_v15 = vadd.f32 %v288_v11, %v258_v5  ;;  %v270_v59 = vmul.f32 %v464_v43, %v464_v43 }
  0x2f   : > { %v274_v9 = vmul.f32 %v472_v61, %v472_v61 }
  0x30   : > { %v222_v4 = vadd.f32 %v444_v62, %v221_v63  ;;  %v290_v20 = vadd.f32 %v289_v15, %v259_v10  ;;  %v271_v63 = vmul.f32 %v465_v48, %v465_v48 }
  0x32   : > { %v223_v8 = vadd.f32 %v445_v3, %v222_v4  ;;  %v291_v24 = vadd.f32 %v290_v20, %v260_v14  ;;  %v272_v3 = vmul.f32 %v468_v52, %v468_v52 }
  0x34   : > { %v224_v13 = vadd.f32 %v448_v7, %v223_v8  ;;  %v292_v29 = vadd.f32 %v291_v24, %v261_v19 }
  0x36   : > { %v225_v17 = vadd.f32 %v449_v12, %v224_v13  ;;  %v293_v33 = vadd.f32 %v292_v29, %v262_v23  ;;  %v275_v12 = vmul.f32 %v473_v1, %v473_v1 }
  0x38   : > { %v226_v22 = vadd.f32 %v452_v16, %v225_v17  ;;  %v294_v38 = vadd.f32 %v293_v33, %v263_v28 }
  0x3a   : > { %v227_v26 = vadd.f32 %v453_v21, %v226_v22  ;;  %v295_v42 = vadd.f32 %v294_v38, %v264_v32  ;;  %v314_v22 = vshrl.u32 %v313_v18, 7 }
  0x3c   : > { %v228_v31 = vadd.f32 %v456_v25, %v227_v26  ;;  %v296_v47 = vadd.f32 %v295_v42, %v265_v37  ;;  %vm315_vm0 = vcmp.eq.s32.totalorder %v314_v22, 0  ;;  %vm317_vm1 = vcmp.eq.s32.totalorder %v314_v22, 1 }
  0x3e   : > { %v229_v35 = vadd.f32 %v457_v30, %v228_v31  ;;  %v297_v51 = vadd.f32 %v296_v47, %v266_v41 }
  0x40   : > { %v230_v40 = vadd.f32 %v460_v34, %v229_v35  ;;  %v298_v56 = vadd.f32 %v297_v51, %v267_v46 }
  0x42   : > { %v231_v44 = vadd.f32 %v461_v39, %v230_v40  ;;  %v299_v60 = vadd.f32 %v298_v56, %v268_v50 }
  0x44   : > { %v232_v49 = vadd.f32 %v464_v43, %v231_v44  ;;  %v300_v0 = vadd.f32 %v299_v60, %v269_v55 }
  0x46   : > { %v233_v53 = vadd.f32 %v465_v48, %v232_v49  ;;  %v301_v4 = vadd.f32 %v300_v0, %v270_v59 }
  0x48   : > { %v234_v58 = vadd.f32 %v468_v52, %v233_v53  ;;  %v302_v7 = vadd.f32 %v301_v4, %v271_v63 }
  0x4a   : > { %v235_v62 = vadd.f32 %v469_v57, %v234_v58  ;;  %v303_v10 = vadd.f32 %v302_v7, %v272_v3 }
  0x4c   : > { %v236_v2 = vadd.f32 %v472_v61, %v235_v62  ;;  %v304_v13 = vadd.f32 %v303_v10, %v273_v6 }
  0x4e   : > { %v237_v5 = vadd.f32 %v473_v1, %v236_v2  ;;  %v305_v15 = vadd.f32 %v304_v13, %v274_v9 }
  0x50   : > { %v238_v8 = vrot.slane %v237_v5, 4  ;;  %v306_v17 = vadd.f32 %v305_v15, %v275_v12 }
  0x52   : > { %v239_v11 = vadd.f32 %v238_v8, %v237_v5  ;;  %v307_v19 = vrot.slane %v306_v17, 4 }
  0x54   : > { %v240_v14 = vrot.slane %v239_v11, 2  ;;  %v308_v21 = vadd.f32 %v307_v19, %v306_v17 }
  0x56   : > { %v241_v16 = vadd.f32 %v240_v14, %v239_v11  ;;  %v309_v23 = vrot.slane %v308_v21, 2 }
  0x58   : > { %v242_v20 = vrot.slane %v241_v16, 1  ;;  %v310_v25 = vadd.f32 %v309_v23, %v308_v21 }
  0x5a   : > { %v243_v24 = vadd.f32 %v242_v20, %v241_v16  ;;  %v311_v26 = vrot.slane %v310_v25, 1 }
  0x5c   : > { %v312_v27 = vadd.f32 %v311_v26, %v310_v25  ;;  %v316_v28 = vsel %vm315_vm0, %v243_v24, 0.0 }
  0x5e   : > { %v318_v29 = vsel %vm317_vm1, %v312_v27, 0.0 }
  0x5f   : > { %v319_v30 = vadd.f32 %v318_v29, %v316_v28 }
  0x61   : > { %324 = vst [vmem:[%s142_s17] sm:$0xff] %v319_v30 }
  0x62 PF: > { %s11_s8 = sadd.s32 1, %s535_s8   ;;  %s604_s6 = smov %s531_s7 }
  0x63   : > { %p8_p5 = scmp.ge.s32.totalorder %s11_s8, 4   ;;  %s605_s7 = smov %s607_s9 }
  0x65   :  { %10 = sbr.rel (!%p8_p5) target bundleno = 2 (0x2), region = 62 }

// kernel: inconv_forward.8
= control target key start
LH: loop header
LB: loop body
LE: loop exit
PB: predicated region body
PF: predicated region fallthrough
CT: control target
= control target key end

     0   :  { %s1475_s18 = smov 0   ;;  %s1477_s19 = smov 0   ;;  %s1815_s0 = inlined_call_operand.vmem [shape: bf16[2,256,128], index: 0, kind: input, shape index: {}]   ;;  %s1816_s1 = inlined_call_operand.vmem [shape: f32[2,8,128], index: 1, kind: input, shape index: {}]   ;;  %s1817_s2 = inlined_call_operand.vmem [shape: f32[128,128], index: 2, kind: input, shape index: {}]   ;;  %s1818_s3 = inlined_call_operand.vmem [shape: f32[1,128], index: 3, kind: input, shape index: {}]   ;;  %s1819_s4 = inlined_call_operand.vmem [shape: f32[1,128], index: 4, kind: input, shape index: {}]   ;;  %s1820_s5 = inlined_call_operand.vmem [shape: bf16[2,256,128], index: 5, kind: output, shape index: {}]  }
   0x1   :  { %s1479_s20 = smov 0  }
   0x2 LB: > { %s27_s21 = sadd.s32 1, %s1436_s19  ;;  %p993_p0 = scmp.ge.s32.totalorder %s1440_s20, 1  ;;  %s1440_s20 = sphi %s1479_s20, %s15_s20   ;;  %s1436_s19 = sphi %s1477_s19, %s1822_s19   ;;  %s1432_s18 = sphi %s1475_s18, %s1821_s18  }
   0x3   : > { %p29_p1 = scmp.ge.s32.totalorder %s27_s21, 2  ;;  %p217_p2 = scmp.lt.s32.totalorder %s1440_s20, 3 }
   0x5   : > { %s1824_s21 = smov (%p29_p1, %s27_s21), 0  ;;  %p218_p3 = pnand %p993_p0, %p217_p2 }
   0x6   : > { %p258_p4 = scmp.lt.s32.totalorder (!%p218_p3), %s1432_s18, 1 }
   0x7   : > { %221 = sbr.rel (%p218_p3) target bundleno = 346 (0x15a), region = 40 }
   0xc   : > { %v297_v0 = vld [vmem:[%s1817_s2 + $0x78] sm:$0xff]  ;;  %v1442_v1 = vmov 0.0   ;;  %v296_v2 = vld [vmem:[%s1817_s2 + $0x70] sm:$0xff]  ;;  %vm1443_vm0 = vmmov 0   ;;  %v295_v3 = vld [vmem:[%s1817_s2 + $0x68] sm:$0xff]  ;;  %s1826_s18 = smov (!%p258_p4, %s1432_s18), 1  ;;  %v381_v27 = vlaneseq }
   0xd   : > { %1290 = vmatprep.subr.mxu0 %v1442_v1  ;;  %1322 = vmatprep.mubr.msk.f32.mxu0 %vm1443_vm0, %v1442_v1  ;;  %v294_v4 = vld [vmem:[%s1817_s2 + $0x60] sm:$0xff]  ;;  %v293_v5 = vld [vmem:[%s1817_s2 + $0x58] sm:$0xff]  ;;  %v292_v6 = vld [vmem:[%s1817_s2 + $0x50] sm:$0xff]  ;;  %s996_s27 = sshll.u32 %s1826_s18, 3  ;;  %v1444_v25 = vmov 1966171168  }
   0xe   : > { %1291 = vmatpush3.msra.mxu0 %v297_v0  ;;  %v291_v7 = vld [vmem:[%s1817_s2 + $0x48] sm:$0xff]  ;;  %v290_v8 = vld [vmem:[%s1817_s2 + $0x40] sm:$0xff]  ;;  %v289_v9 = vld [vmem:[%s1817_s2 + $0x38] sm:$0xff]  ;;  %s270_s9 = scalar_lea.vmem %s1816_s1, %s996_s27  ;;  %v379_v26 = vunpack.c.l.s4 %v1444_v25  ;;  %v1551_v29 = vshrl.u32 %v381_v27, 7  ;;  %s1065_s12 = sshll.u32 %s1826_s18, 7 }
   0xf   : > { %1292 = vmatprep.subr.mxu0 %v1442_v1  ;;  %v288_v10 = vld [vmem:[%s1817_s2 + $0x30] sm:$0xff]  ;;  %v287_v11 = vld [vmem:[%s1817_s2 + $0x28] sm:$0xff]  ;;  %v286_v12 = vld [vmem:[%s1817_s2 + $0x20] sm:$0xff]  ;;  %s1560_s15 = scalar_lea.vmem %s1815_s0, %s1065_s12  ;;  %s1699_s26 = scalar_lea.vmem %s1820_s5, %s1065_s12 }
  0x10   : > { %1293 = vmatpush3.msra.mxu0 %v296_v2  ;;  %v285_v13 = vld [vmem:[%s1817_s2 + $0x18] sm:$0xff]  ;;  %v284_v14 = vld [vmem:[%s1817_s2 + $0x10] sm:$0xff]  ;;  %v283_v15 = vld [vmem:[%s1817_s2 + $0x8] sm:$0xff]  ;;  %v380_v28 = vunpack.c.0.s8 %v379_v26  ;;  %v465_v53 = vsub.s32 0, %v1551_v29 }
  0x11   : > { %1294 = vmatprep.subr.mxu0 %v1442_v1  ;;  %v282_v16 = vld [vmem:[%s1817_s2] sm:$0xff]  ;;  %v1243_v36 = vld [vmem:[%s1560_s15 + $0x8] sm:$0xff]   ;;  %v1244_v38 = vld [vmem:[%s1560_s15 + $0x10] sm:$0xff]  }
  0x12   : > { %1295 = vmatpush3.msra.mxu0 %v295_v3  ;;  %v281_v17 = vld [vmem:[%s270_s9] sm:$0xff]  ;;  %v383_v30 = vsub.s32 %v380_v28, %v1551_v29  ;;  %v1245_v39 = vld [vmem:[%s1560_s15 + $0x18] sm:$0xff]   ;;  %v1247_v42 = vld [vmem:[%s1560_s15 + $0x28] sm:$0xff]   ;;  %v1105_v44 = vunpack.c.l.bf16 %v1243_v36  ;;  %v1106_v45 = vunpack.c.h.bf16 %v1243_v36  ;;  %v1109_v49 = vunpack.c.l.bf16 %v1244_v38 }
  0x13   : > { %1296 = vmatprep.subr.mxu0 %v1442_v1  ;;  %v1100_v34 = vld [vmem:[%s1560_s15] sm:$0xff]   ;;  %v1248_v46 = vld [vmem:[%s1560_s15 + $0x30] sm:$0xff]   ;;  %v1249_v47 = vld [vmem:[%s1560_s15 + $0x38] sm:$0xff]   ;;  %v1110_v50 = vunpack.c.h.bf16 %v1244_v38  ;;  %v1113_v51 = vunpack.c.l.bf16 %v1245_v39  ;;  %v1114_v54 = vunpack.c.h.bf16 %v1245_v39  ;;  %v1121_v57 = vunpack.c.l.bf16 %v1247_v42 }
  0x14   : > { %1297 = vmatpush3.msra.mxu0 %v294_v4  ;;  %v376_v37 = vld [vmem:[%s1818_s3] sm:$0x1]  ;;  %v1101_v40 = vunpack.c.l.bf16 %v1100_v34  ;;  %v1102_v43 = vunpack.c.h.bf16 %v1100_v34  ;;  %v1251_v58 = vld [vmem:[%s1560_s15 + $0x48] sm:$0xff]   ;;  %v1252_v59 = vld [vmem:[%s1560_s15 + $0x50] sm:$0xff]   ;;  %v1122_v60 = vunpack.c.h.bf16 %v1247_v42  ;;  %v1125_v61 = vunpack.c.l.bf16 %v1248_v46 }
  0x15   : > { %1298 = vmatprep.subr.mxu0 %v1442_v1  ;;  %v1246_v41 = vld [vmem:[%s1560_s15 + $0x20] sm:$0xff]   ;;  %v1126_v62 = vunpack.c.h.bf16 %v1248_v46  ;;  %v1129_v63 = vunpack.c.l.bf16 %v1249_v47  ;;  %v1253_v0 = vld [vmem:[%s1560_s15 + $0x58] sm:$0xff]   ;;  %v1130_v2 = vunpack.c.h.bf16 %v1249_v47 }
  0x16   : > { %1299 = vmatpush3.msra.mxu0 %v293_v5  ;;  %v1250_v52 = vld [vmem:[%s1560_s15 + $0x40] sm:$0xff]   ;;  %v1117_v55 = vunpack.c.l.bf16 %v1246_v41  ;;  %v1118_v56 = vunpack.c.h.bf16 %v1246_v41  ;;  %v1255_v5 = vld [vmem:[%s1560_s15 + $0x68] sm:$0xff]  }
  0x17   : > { %1300 = vmatprep.subr.mxu0 %v1442_v1  ;;  %v1133_v3 = vunpack.c.l.bf16 %v1250_v52  ;;  %v1134_v4 = vunpack.c.h.bf16 %v1250_v52 }
  0x18   : > { %1301 = vmatpush3.msra.mxu0 %v292_v6  ;;  %v1256_v6 = vld [vmem:[%s1560_s15 + $0x70] sm:$0xff]  }
  0x19   : > { %1302 = vmatprep.subr.mxu0 %v1442_v1 }
  0x1a   : > { %1303 = vmatpush3.msra.mxu0 %v291_v7 }
  0x1b   : > { %1304 = vmatprep.subr.mxu0 %v1442_v1 }
  0x1c   : > { %1305 = vmatpush3.msra.mxu0 %v290_v8  ;;  %v1137_v8 = vunpack.c.l.bf16 %v1251_v58 }
  0x1d   : > { %1306 = vmatprep.subr.mxu0 %v1442_v1 }
  0x1e   : > { %1307 = vmatpush3.msra.mxu0 %v289_v9  ;;  %v1138_v9 = vunpack.c.h.bf16 %v1251_v58 }
  0x1f   : > { %1308 = vmatprep.subr.mxu0 %v1442_v1 }
  0x20   : > { %1309 = vmatpush3.msra.mxu0 %v288_v10  ;;  %v1141_v10 = vunpack.c.l.bf16 %v1252_v59 }
  0x21   : > { %1310 = vmatprep.subr.mxu0 %v1442_v1 }
  0x22   : > { %1311 = vmatpush3.msra.mxu0 %v287_v11  ;;  %v1257_v11 = vld [vmem:[%s1560_s15 + $0x78] sm:$0xff]  }
  0x23   : > { %1312 = vmatprep.subr.mxu0 %v1442_v1 }
  0x24   : > { %1313 = vmatpush3.msra.mxu0 %v286_v12  ;;  %v395_v12 = vld [vmem:[%s1819_s4] sm:$0x1] }
  0x25   : > { %1314 = vmatprep.subr.mxu0 %v1442_v1 }
  0x26   : > { %1315 = vmatpush3.msra.mxu0 %v285_v13 }
  0x27   : > { %1316 = vmatprep.subr.mxu0 %v1442_v1 }
  0x28   : > { %1317 = vmatpush3.msra.mxu0 %v284_v14  ;;  %v1142_v14 = vunpack.c.h.bf16 %v1252_v59 }
  0x29   : > { %1318 = vmatprep.subr.mxu0 %v1442_v1 }
  0x2a   : > { %1319 = vmatpush3.msra.mxu0 %v283_v15  ;;  %v1145_v15 = vunpack.c.l.bf16 %v1253_v0 }
  0x2b   : > { %1320 = vmatprep.subr.mxu0 %v1442_v1  ;;  %v1254_v1 = vld [vmem:[%s1560_s15 + $0x60] sm:$0xff]  }
  0x2c   : > { %1321 = vmatpush3.msra.mxu0 %v282_v16  ;;  %v1146_v16 = vunpack.c.h.bf16 %v1253_v0 }
  0x2d   : > { %1323 = vmatmul.mubr.f32.vlgmr.msra.gmra.mxu0 %v281_v17  ;;  %v1149_v17 = vunpack.c.l.bf16 %v1254_v1 }
  0xed   : > { %v364_v18 = vpop.f32.mrf.mxu0 }
  0xee   : > { %v368_v19 = vmul.f32 %v364_v18, %v364_v18 }
  0xef   : > { %v1324_v20 = vpop.f32.mrf.mxu0 }
  0xf0   : > { %v370_v21 = vrot.slane %v368_v19, 7  ;;  %v1150_v19 = vunpack.c.h.bf16 %v1254_v1  ;;  %v1153_v20 = vunpack.c.l.bf16 %v1255_v5 }
  0xf2   : > { %v372_v22 = vsub.f32 %v364_v18, %v370_v21  ;;  %v1154_v21 = vunpack.c.h.bf16 %v1255_v5 }
  0xf4   : > { %v373_v23 = vmax.f32 %v372_v22, 0.0  ;;  %v1157_v22 = vunpack.c.l.bf16 %v1256_v6 }
  0xf6   : > { %v374_v24 = vadd.f32 1e-05, %v373_v23  ;;  %v1158_v23 = vunpack.c.h.bf16 %v1256_v6 }
  0xf8   : > { %1352 = vrsqrt.f32 %v374_v24  ;;  %v1161_v24 = vunpack.c.l.bf16 %v1257_v11 }
 0x105   : > { %v1353_v31 = vpop.eup %1352 }
 0x106   : > { %v384_v32 = vrot.slane %v1353_v31, %v383_v30 }
 0x108   : > { %v385_v33 = vcombine.high %v384_v32, %v384_v32 }
 0x10a   : > { %v392_v35 = vrot.slane %v385_v33, %v383_v30 }
 0x10c   : > { %v394_v48 = vmul.f32 %v392_v35, %v376_v37 }
 0x10e   : > { %v396_v7 = vmul.f32 %v394_v48, %v364_v18  ;;  %v466_v13 = vrot.slane %v394_v48, %v465_v53  ;;  %v1162_v18 = vunpack.c.h.bf16 %v1257_v11 }
 0x110   : > { %v397_v25 = vsub.f32 %v395_v12, %v396_v7  ;;  %v468_v26 = vmul.f32 %v1101_v40, %v466_v13  ;;  %v469_v27 = vmul.f32 %v1102_v43, %v466_v13  ;;  %v470_v28 = vmul.f32 %v1105_v44, %v466_v13 }
 0x111   : > { %v471_v29 = vmul.f32 %v1106_v45, %v466_v13  ;;  %v472_v30 = vmul.f32 %v1109_v49, %v466_v13  ;;  %v473_v31 = vmul.f32 %v1110_v50, %v466_v13  ;;  %v474_v32 = vmul.f32 %v1113_v51, %v466_v13 }
 0x112   : > { %v475_v33 = vmul.f32 %v1114_v54, %v466_v13  ;;  %v476_v34 = vmul.f32 %v1117_v55, %v466_v13  ;;  %v477_v35 = vmul.f32 %v1118_v56, %v466_v13  ;;  %v478_v36 = vmul.f32 %v1121_v57, %v466_v13 }
 0x113   : > { %v479_v37 = vmul.f32 %v1122_v60, %v466_v13  ;;  %v480_v38 = vmul.f32 %v1125_v61, %v466_v13  ;;  %v481_v39 = vmul.f32 %v1126_v62, %v466_v13  ;;  %v482_v41 = vmul.f32 %v1129_v63, %v466_v13 }
 0x114   : > { %v483_v42 = vmul.f32 %v1130_v2, %v466_v13  ;;  %v484_v46 = vmul.f32 %v1133_v3, %v466_v13  ;;  %v485_v47 = vmul.f32 %v1134_v4, %v466_v13  ;;  %v486_v48 = vmul.f32 %v1137_v8, %v466_v13 }
 0x115   : > { %v504_v52 = vrot.slane %v397_v25, %v465_v53  ;;  %v487_v40 = vmul.f32 %v1138_v9, %v466_v13  ;;  %v488_v43 = vmul.f32 %v1141_v10, %v466_v13  ;;  %v489_v44 = vmul.f32 %v1142_v14, %v466_v13 }
 0x116   : > { %v490_v45 = vmul.f32 %v1145_v15, %v466_v13  ;;  %v491_v49 = vmul.f32 %v1146_v16, %v466_v13  ;;  %v492_v50 = vmul.f32 %v1149_v17, %v466_v13  ;;  %v493_v51 = vmul.f32 %v1150_v19, %v466_v13 }
 0x117   : > { %v494_v54 = vmul.f32 %v1153_v20, %v466_v13  ;;  %v495_v55 = vmul.f32 %v1154_v21, %v466_v13  ;;  %v496_v56 = vmul.f32 %v1157_v22, %v466_v13  ;;  %v497_v57 = vmul.f32 %v1158_v23, %v466_v13 }
 0x118   : > { %v498_v58 = vmul.f32 %v1161_v24, %v466_v13  ;;  %v499_v59 = vmul.f32 %v1162_v18, %v466_v13  ;;  %v1585_v60 = vadd.f32 %v504_v52, %v468_v26  ;;  %v1587_v61 = vadd.f32 %v504_v52, %v469_v27 }
 0x119   : > { %v1589_v62 = vadd.f32 %v504_v52, %v470_v28  ;;  %v1591_v53 = vadd.f32 %v504_v52, %v471_v29  ;;  %v1593_v63 = vadd.f32 %v504_v52, %v472_v30  ;;  %v1595_v0 = vadd.f32 %v504_v52, %v473_v31 }
 0x11a   : > { %v1597_v1 = vadd.f32 %v504_v52, %v474_v32  ;;  %v1599_v2 = vadd.f32 %v504_v52, %v475_v33  ;;  %v1601_v3 = vadd.f32 %v504_v52, %v476_v34  ;;  %v1603_v4 = vadd.f32 %v504_v52, %v477_v35 }
 0x11b   : > { %v1605_v5 = vadd.f32 %v504_v52, %v478_v36  ;;  %v1607_v6 = vadd.f32 %v504_v52, %v479_v37  ;;  %v1609_v7 = vadd.f32 %v504_v52, %v480_v38  ;;  %v1611_v8 = vadd.f32 %v504_v52, %v481_v39 }
 0x11c   : > { %v1613_v9 = vadd.f32 %v504_v52, %v482_v41  ;;  %v1615_v10 = vadd.f32 %v504_v52, %v483_v42  ;;  %v1617_v11 = vadd.f32 %v504_v52, %v484_v46  ;;  %v1619_v12 = vadd.f32 %v504_v52, %v485_v47 }
 0x11d   : > { %v1621_v13 = vadd.f32 %v504_v52, %v486_v48  ;;  %v1623_v14 = vadd.f32 %v504_v52, %v487_v40  ;;  %v570_v15 = vmin.f32 %v1585_v60, 0.0  ;;  %v571_v16 = vmin.f32 %v1587_v61, 0.0 }
 0x11e   : > { %v572_v17 = vmin.f32 %v1589_v62, 0.0  ;;  %v1628_v19 = vadd.f32 %v504_v52, %v488_v43  ;;  %v1630_v20 = vadd.f32 %v504_v52, %v489_v44  ;;  %v1632_v21 = vadd.f32 %v504_v52, %v490_v45 }
 0x11f   : > { %v573_v22 = vmin.f32 %v1591_v53, 0.0  ;;  %v1635_v23 = vadd.f32 %v504_v52, %v491_v49  ;;  %v1637_v24 = vadd.f32 %v504_v52, %v492_v50  ;;  %v1639_v18 = vadd.f32 %v504_v52, %v493_v51 }
 0x120   : > { %v574_v25 = vmin.f32 %v1593_v63, 0.0  ;;  %v1642_v26 = vadd.f32 %v504_v52, %v494_v54  ;;  %v1644_v27 = vadd.f32 %v504_v52, %v495_v55  ;;  %v575_v28 = vmin.f32 %v1595_v0, 0.0 }
 0x121   : > { %v576_v29 = vmin.f32 %v1597_v1, 0.0  ;;  %v1648_v30 = vadd.f32 %v504_v52, %v496_v56  ;;  %v602_v31 = vmul.f32 1.442695, %v570_v15  ;;  %v604_v32 = vmul.f32 1.442695, %v571_v16 }
 0x122   : > { %v606_v33 = vmul.f32 1.442695, %v572_v17  ;;  %v1650_v34 = vadd.f32 %v504_v52, %v497_v57  ;;  %v1652_v35 = vadd.f32 %v504_v52, %v498_v58  ;;  %v577_v36 = vmin.f32 %v1599_v2, 0.0 }
 0x123   : > { %v608_v37 = vmul.f32 1.442695, %v573_v22  ;;  %v1655_v38 = vadd.f32 %v504_v52, %v499_v59  ;;  %v578_v39 = vmin.f32 %v1601_v3, 0.0  ;;  %1354 = vpow2.f32 %v602_v31 }
 0x124   : > { %v610_v41 = vmul.f32 1.442695, %v574_v25  ;;  %v579_v42 = vmin.f32 %v1603_v4, 0.0  ;;  %v580_v46 = vmin.f32 %v1605_v5, 0.0  ;;  %1356 = vpow2.f32 %v604_v32 }
 0x125   : > { %v612_v47 = vmul.f32 1.442695, %v575_v28  ;;  %v581_v48 = vmin.f32 %v1607_v6, 0.0  ;;  %v582_v40 = vmin.f32 %v1609_v7, 0.0  ;;  %1358 = vpow2.f32 %v606_v33 }
 0x126   : > { %v614_v43 = vmul.f32 1.442695, %v576_v29  ;;  %v583_v44 = vmin.f32 %v1611_v8, 0.0  ;;  %v584_v52 = vmin.f32 %v1613_v9, 0.0  ;;  %1360 = vpow2.f32 %v608_v37 }
 0x127   : > { %v616_v45 = vmul.f32 1.442695, %v577_v36  ;;  %v585_v49 = vmin.f32 %v1615_v10, 0.0  ;;  %v586_v50 = vmin.f32 %v1617_v11, 0.0  ;;  %1362 = vpow2.f32 %v610_v41 }
 0x128   : > { %v618_v51 = vmul.f32 1.442695, %v578_v39  ;;  %v587_v54 = vmin.f32 %v1619_v12, 0.0  ;;  %v588_v55 = vmin.f32 %v1621_v13, 0.0  ;;  %1364 = vpow2.f32 %v612_v47 }
 0x129   : > { %v620_v56 = vmul.f32 1.442695, %v579_v42  ;;  %v589_v57 = vmin.f32 %v1623_v14, 0.0  ;;  %v590_v58 = vmin.f32 %v1628_v19, 0.0  ;;  %1366 = vpow2.f32 %v614_v43 }
 0x12a   : > { %v622_v59 = vmul.f32 1.442695, %v580_v46  ;;  %vm538_vm1 = vcmp.gt.f32.partialorder %v1585_v60, 0.0  ;;  %v591_v15 = vmin.f32 %v1630_v20, 0.0  ;;  %v592_v16 = vmin.f32 %v1632_v21, 0.0 }
 0x12b   : > { %1368 = vpow2.f32 %v616_v45  ;;  %v624_v17 = vmul.f32 1.442695, %v581_v48  ;;  %vm539_vm2 = vcmp.gt.f32.partialorder %v1587_v61, 0.0  ;;  %v593_v22 = vmin.f32 %v1635_v23, 0.0 }
 0x12c   : > { %v594_v25 = vmin.f32 %v1637_v24, 0.0  ;;  %1370 = vpow2.f32 %v618_v51  ;;  %v626_v28 = vmul.f32 1.442695, %v582_v40  ;;  %vm540_vm3 = vcmp.gt.f32.partialorder %v1589_v62, 0.0 }
 0x12d   : > { %v595_v29 = vmin.f32 %v1639_v18, 0.0  ;;  %v596_v31 = vmin.f32 %v1642_v26, 0.0  ;;  %1372 = vpow2.f32 %v620_v56  ;;  %v628_v32 = vmul.f32 1.442695, %v583_v44 }
 0x12e   : > { %vm541_vm4 = vcmp.gt.f32.partialorder %v1591_v53, 0.0  ;;  %v597_v33 = vmin.f32 %v1644_v27, 0.0  ;;  %v598_v36 = vmin.f32 %v1648_v30, 0.0  ;;  %1374 = vpow2.f32 %v622_v59 }
 0x12f   : > { %v630_v37 = vmul.f32 1.442695, %v584_v52  ;;  %vm542_vm5 = vcmp.gt.f32.partialorder %v1593_v63, 0.0  ;;  %v599_v39 = vmin.f32 %v1650_v34, 0.0  ;;  %v600_v41 = vmin.f32 %v1652_v35, 0.0 }
 0x130   : > { %1376 = vpow2.f32 %v624_v17  ;;  %v632_v42 = vmul.f32 1.442695, %v585_v49  ;;  %vm543_vm6 = vcmp.gt.f32.partialorder %v1595_v0, 0.0  ;;  %v601_v46 = vmin.f32 %v1655_v38, 0.0  ;;  %v1355_v40 = vpop.eup %1354 }
 0x131   : > { %1378 = vpow2.f32 %v626_v28  ;;  %v634_v47 = vmul.f32 1.442695, %v586_v50  ;;  %v636_v48 = vmul.f32 1.442695, %v587_v54  ;;  %vm544_vm7 = vcmp.gt.f32.partialorder %v1597_v1, 0.0  ;;  %v1357_v45 = vpop.eup %1356 }
 0x132   : > { %1380 = vpow2.f32 %v628_v32  ;;  %v638_v43 = vmul.f32 1.442695, %v588_v55  ;;  %v640_v44 = vmul.f32 1.442695, %v589_v57  ;;  %v642_v52 = vmul.f32 1.442695, %v590_v58  ;;  %v1359_v59 = vpop.eup %1358 }
 0x133   : > { %vm545_vm8 = vcmp.gt.f32.partialorder %v1599_v2, 0.0  ;;  %1382 = vpow2.f32 %v630_v37  ;;  %v644_v51 = vmul.f32 1.442695, %v591_v15  ;;  %v646_v49 = vmul.f32 1.442695, %v592_v16  ;;  %v1361_v28 = vpop.eup %1360 }
 0x134   : > { %v999_v56 = vadd.f32 -1.0, %v1355_v40  ;;  %vm546_vm9 = vcmp.gt.f32.partialorder %v1601_v3, 0.0  ;;  %1384 = vpow2.f32 %v632_v42  ;;  %v648_v50 = vmul.f32 1.442695, %v593_v22  ;;  %v1363_v15 = vpop.eup %1362 }
 0x135   : > { %v650_v54 = vmul.f32 1.442695, %v594_v25  ;;  %v1000_v17 = vadd.f32 -1.0, %v1357_v45  ;;  %vm547_vm10 = vcmp.gt.f32.partialorder %v1603_v4, 0.0  ;;  %1386 = vpow2.f32 %v634_v47 }
 0x136   : > { %v652_v55 = vmul.f32 1.442695, %v595_v29  ;;  %v1001_v57 = vadd.f32 -1.0, %v1359_v59  ;;  %v698_v58 = vsel %vm538_vm1, %v1585_v60, %v999_v56  ;;  %vm548_vm11 = vcmp.gt.f32.partialorder %v1605_v5, 0.0  ;;  %v1365_v29 = vpop.eup %1364 }
 0x137   : > { %1388 = vpow2.f32 %v636_v48  ;;  %v654_v16 = vmul.f32 1.442695, %v596_v31  ;;  %v1002_v22 = vadd.f32 -1.0, %v1361_v28  ;;  %v699_v25 = vsel %vm539_vm2, %v1587_v61, %v1000_v17  ;;  %v1367_v42 = vpop.eup %1366 }
 0x138   : > { %vm549_vm12 = vcmp.gt.f32.partialorder %v1607_v6, 0.0  ;;  %1390 = vpow2.f32 %v638_v43  ;;  %v1003_v60 = vadd.f32 -1.0, %v1363_v15  ;;  %v700_v32 = vsel %vm540_vm3, %v1589_v62, %v1001_v57  ;;  %v1369_v48 = vpop.eup %1368 }
 0x139   : > { %v1166_v37 = vpack.c.bf16 %v699_v25, %v698_v58  ;;  %vm550_vm13 = vcmp.gt.f32.partialorder %v1609_v7, 0.0  ;;  %1392 = vpow2.f32 %v640_v44  ;;  %v656_v31 = vmul.f32 1.442695, %v597_v33  ;;  %v1371_v45 = vpop.eup %1370 }
 0x13a   : > { %v1004_v47 = vadd.f32 -1.0, %v1365_v29  ;;  %v701_v61 = vsel %vm541_vm4, %v1591_v53, %v1002_v22  ;;  %vm551_vm14 = vcmp.gt.f32.partialorder %v1611_v8, 0.0  ;;  %1394 = vpow2.f32 %v642_v52  ;;  %v1373_v52 = vpop.eup %1372 }
 0x13b   : > { %v1005_v40 = vadd.f32 -1.0, %v1367_v42  ;;  %v702_v62 = vsel %vm542_vm5, %v1593_v63, %v1003_v60  ;;  %1167 = vst [vmem:[%s1699_s26] sm:$0xff] %v1166_v37   ;;  %v1171_v43 = vpack.c.bf16 %v701_v61, %v700_v32  ;;  %vm552_vm15 = vcmp.gt.f32.partialorder %v1613_v9, 0.0  ;;  %v1375_v17 = vpop.eup %1374 }
 0x13c   : > { %1396 = vpow2.f32 %v644_v51  ;;  %v658_v33 = vmul.f32 1.442695, %v598_v36  ;;  %v1006_v53 = vadd.f32 -1.0, %v1369_v48  ;;  %v703_v44 = vsel %vm543_vm6, %v1595_v0, %v1004_v47 }
 0x13d   : > { %1398 = vpow2.f32 %v646_v49  ;;  %v1007_v56 = vadd.f32 -1.0, %v1371_v45  ;;  %v704_v63 = vsel %vm544_vm7, %v1597_v1, %v1005_v40  ;;  %1258 = vst [vmem:[%s1699_s26 + $0x8] sm:$0xff] %v1171_v43   ;;  %v1176_v59 = vpack.c.bf16 %v703_v44, %v702_v62  ;;  %v1377_v28 = vpop.eup %1376 }
 0x13e   : > { %1400 = vpow2.f32 %v648_v50  ;;  %v660_v36 = vmul.f32 1.442695, %v599_v39  ;;  %v1008_v51 = vadd.f32 -1.0, %v1373_v52  ;;  %v705_v0 = vsel %vm545_vm8, %v1599_v2, %v1006_v53  ;;  %v1379_v58 = vpop.eup %1378 }
 0x13f   : > { %1402 = vpow2.f32 %v650_v54  ;;  %v1009_v49 = vadd.f32 -1.0, %v1375_v17  ;;  %v706_v1 = vsel %vm546_vm9, %v1601_v3, %v1007_v56  ;;  %1259 = vst [vmem:[%s1699_s26 + $0x10] sm:$0xff] %v1176_v59   ;;  %v1181_v57 = vpack.c.bf16 %v705_v0, %v704_v63  ;;  %v1381_v15 = vpop.eup %1380 }
 0x140   : > { %1404 = vpow2.f32 %v652_v55  ;;  %v662_v39 = vmul.f32 1.442695, %v600_v41  ;;  %v1010_v50 = vadd.f32 -1.0, %v1377_v28  ;;  %v707_v2 = vsel %vm547_vm10, %v1603_v4, %v1008_v51  ;;  %v1383_v25 = vpop.eup %1382 }
 0x141   : > { %1406 = vpow2.f32 %v654_v16  ;;  %v1011_v54 = vadd.f32 -1.0, %v1379_v58  ;;  %v708_v3 = vsel %vm548_vm11, %v1605_v5, %v1009_v49  ;;  %1260 = vst [vmem:[%s1699_s26 + $0x18] sm:$0xff] %v1181_v57   ;;  %v1186_v22 = vpack.c.bf16 %v707_v2, %v706_v1  ;;  %v1385_v29 = vpop.eup %1384 }
 0x142   : > { %1408 = vpow2.f32 %v656_v31  ;;  %v664_v41 = vmul.f32 1.442695, %v601_v46  ;;  %v1012_v55 = vadd.f32 -1.0, %v1381_v15  ;;  %v709_v4 = vsel %vm549_vm12, %v1607_v6, %v1010_v50  ;;  %v1387_v32 = vpop.eup %1386 }
 0x143   : > { %1410 = vpow2.f32 %v658_v33  ;;  %v1013_v16 = vadd.f32 -1.0, %v1383_v25  ;;  %v710_v5 = vsel %vm550_vm13, %v1609_v7, %v1011_v54  ;;  %1261 = vst [vmem:[%s1699_s26 + $0x20] sm:$0xff] %v1186_v22   ;;  %v1191_v60 = vpack.c.bf16 %v709_v4, %v708_v3 }
 0x144   : > { %vm553_vm0 = vcmp.gt.f32.partialorder %v1615_v10, 0.0  ;;  %1412 = vpow2.f32 %v660_v36  ;;  %v1014_v46 = vadd.f32 -1.0, %v1385_v29  ;;  %v711_v37 = vsel %vm551_vm14, %v1611_v8, %v1012_v55  ;;  %v1389_v6 = vpop.eup %1388 }
 0x145   : > { %1414 = vpow2.f32 %v662_v39  ;;  %v1015_v42 = vadd.f32 -1.0, %v1387_v32  ;;  %v712_v31 = vsel %vm552_vm15, %v1613_v9, %v1013_v16  ;;  %1262 = vst [vmem:[%s1699_s26 + $0x28] sm:$0xff] %v1191_v60   ;;  %v1196_v7 = vpack.c.bf16 %v711_v37, %v710_v5  ;;  %v1391_v47 = vpop.eup %1390 }
 0x146   : > { %vm554_vm1 = vcmp.gt.f32.partialorder %v1617_v11, 0.0  ;;  %1416 = vpow2.f32 %v664_v41  ;;  %v1016_v61 = vadd.f32 -1.0, %v1389_v6  ;;  %v713_v48 = vsel %vm553_vm0, %v1615_v10, %v1014_v46  ;;  %v1393_v40 = vpop.eup %1392 }
 0x147   : > { %vm555_vm2 = vcmp.gt.f32.partialorder %v1619_v12, 0.0  ;;  %v1017_v8 = vadd.f32 -1.0, %v1391_v47  ;;  %v714_v62 = vsel %vm554_vm1, %v1617_v11, %v1015_v42  ;;  %1263 = vst [vmem:[%s1699_s26 + $0x30] sm:$0xff] %v1196_v7   ;;  %v1201_v43 = vpack.c.bf16 %v713_v48, %v712_v31  ;;  %v1395_v45 = vpop.eup %1394 }
 0x148   : > { %vm556_vm3 = vcmp.gt.f32.partialorder %v1621_v13, 0.0  ;;  %v1018_v9 = vadd.f32 -1.0, %v1393_v40  ;;  %v715_v33 = vsel %vm555_vm2, %v1619_v12, %v1016_v61  ;;  %vm557_vm4 = vcmp.gt.f32.partialorder %v1623_v14, 0.0 }
 0x149   : > { %v1397_v53 = vpop.eup %1396  ;;  %v1019_v44 = vadd.f32 -1.0, %v1395_v45  ;;  %v716_v10 = vsel %vm556_vm3, %v1621_v13, %v1017_v8  ;;  %1264 = vst [vmem:[%s1699_s26 + $0x38] sm:$0xff] %v1201_v43   ;;  %v1206_v52 = vpack.c.bf16 %v715_v33, %v714_v62  ;;  %vm558_vm5 = vcmp.gt.f32.partialorder %v1628_v19, 0.0 }
 0x14a   : > { %v1399_v56 = vpop.eup %1398  ;;  %v1020_v11 = vadd.f32 -1.0, %v1397_v53  ;;  %v717_v63 = vsel %vm557_vm4, %v1623_v14, %v1018_v9  ;;  %vm559_vm6 = vcmp.gt.f32.partialorder %v1630_v20, 0.0  ;;  %vm560_vm7 = vcmp.gt.f32.partialorder %v1632_v21, 0.0 }
 0x14b   : > { %v1401_v59 = vpop.eup %1400  ;;  %v1021_v17 = vadd.f32 -1.0, %v1399_v56  ;;  %v718_v12 = vsel %vm558_vm5, %v1628_v19, %v1019_v44  ;;  %1265 = vst [vmem:[%s1699_s26 + $0x40] sm:$0xff] %v1206_v52   ;;  %v1211_v36 = vpack.c.bf16 %v717_v63, %v716_v10  ;;  %vm561_vm8 = vcmp.gt.f32.partialorder %v1635_v23, 0.0 }
 0x14c   : > { %v1403_v51 = vpop.eup %1402  ;;  %v1022_v13 = vadd.f32 -1.0, %v1401_v59  ;;  %v719_v0 = vsel %vm559_vm6, %v1630_v20, %v1020_v11  ;;  %vm562_vm9 = vcmp.gt.f32.partialorder %v1637_v24, 0.0  ;;  %vm563_vm10 = vcmp.gt.f32.partialorder %v1639_v18, 0.0 }
 0x14d   : > { %v1405_v28 = vpop.eup %1404  ;;  %v1023_v49 = vadd.f32 -1.0, %v1403_v51  ;;  %v720_v14 = vsel %vm560_vm7, %v1632_v21, %v1021_v17  ;;  %1266 = vst [vmem:[%s1699_s26 + $0x48] sm:$0xff] %v1211_v36   ;;  %v1216_v1 = vpack.c.bf16 %v719_v0, %v718_v12  ;;  %vm564_vm11 = vcmp.gt.f32.partialorder %v1642_v26, 0.0 }
 0x14e   : > { %v1407_v57 = vpop.eup %1406  ;;  %v1024_v19 = vadd.f32 -1.0, %v1405_v28  ;;  %v721_v58 = vsel %vm561_vm8, %v1635_v23, %v1022_v13  ;;  %vm565_vm12 = vcmp.gt.f32.partialorder %v1644_v27, 0.0  ;;  %vm566_vm13 = vcmp.gt.f32.partialorder %v1648_v30, 0.0 }
 0x14f   : > { %v1409_v39 = vpop.eup %1408  ;;  %v1025_v50 = vadd.f32 -1.0, %v1407_v57  ;;  %v722_v20 = vsel %vm562_vm9, %v1637_v24, %v1023_v49  ;;  %1267 = vst [vmem:[%s1699_s26 + $0x50] sm:$0xff] %v1216_v1   ;;  %v1221_v2 = vpack.c.bf16 %v721_v58, %v720_v14  ;;  %vm567_vm14 = vcmp.gt.f32.partialorder %v1650_v34, 0.0 }
 0x150   : > { %v1411_v15 = vpop.eup %1410  ;;  %v1026_v21 = vadd.f32 -1.0, %v1409_v39  ;;  %v723_v54 = vsel %vm563_vm10, %v1639_v18, %v1024_v19  ;;  %vm568_vm15 = vcmp.gt.f32.partialorder %v1652_v35, 0.0  ;;  %vm569_vm0 = vcmp.gt.f32.partialorder %v1655_v38, 0.0 }
 0x151   : > { %v1413_v3 = vpop.eup %1412  ;;  %v1027_v22 = vadd.f32 -1.0, %v1411_v15  ;;  %v724_v23 = vsel %vm564_vm11, %v1642_v26, %v1025_v50  ;;  %1268 = vst [vmem:[%s1699_s26 + $0x58] sm:$0xff] %v1221_v2   ;;  %v1226_v25 = vpack.c.bf16 %v723_v54, %v722_v20 }
 0x152   : > { %v1415_v41 = vpop.eup %1414  ;;  %v1028_v24 = vadd.f32 -1.0, %v1413_v3  ;;  %v725_v55 = vsel %vm565_vm12, %v1644_v27, %v1026_v21 }
 0x153   : > { %v1417_v4 = vpop.eup %1416  ;;  %v1029_v18 = vadd.f32 -1.0, %v1415_v41  ;;  %v726_v29 = vsel %vm566_vm13, %v1648_v30, %v1027_v22  ;;  %1269 = vst [vmem:[%s1699_s26 + $0x60] sm:$0xff] %v1226_v25   ;;  %v1231_v16 = vpack.c.bf16 %v725_v55, %v724_v23 }
 0x154   : > { %v1030_v26 = vadd.f32 -1.0, %v1417_v4  ;;  %v727_v5 = vsel %vm567_vm14, %v1650_v34, %v1028_v24 }
 0x155   : > { %v728_v60 = vsel %vm568_vm15, %v1652_v35, %v1029_v18  ;;  %1270 = vst [vmem:[%s1699_s26 + $0x68] sm:$0xff] %v1231_v16   ;;  %v1236_v27 = vpack.c.bf16 %v727_v5, %v726_v29 }
 0x156   : > { %v729_v32 = vsel %vm569_vm0, %v1655_v38, %v1030_v26 }
 0x157   : > { %1271 = vst [vmem:[%s1699_s26 + $0x70] sm:$0xff] %v1236_v27   ;;  %v1241_v46 = vpack.c.bf16 %v729_v32, %v728_v60 }
 0x159   : > { %1272 = vst [vmem:[%s1699_s26 + $0x78] sm:$0xff] %v1241_v46  }
 0x15a PF: > { %s15_s20 = sadd.s32 1, %s1440_s20   ;;  %s1821_s18 = smov %s1436_s19 }
 0x15b   : > { %p12_p5 = scmp.ge.s32.totalorder %s15_s20, 4   ;;  %s1822_s19 = smov %s1824_s21 }
 0x15d   :  { %14 = sbr.rel (!%p12_p5) target bundleno = 2 (0x2), region = 73 }

// kernel: inconv_forward.6
= control target key start
LH: loop header
LB: loop body
LE: loop exit
PB: predicated region body
PF: predicated region fallthrough
CT: control target
= control target key end

     0   :  { %s1467_s12 = smov 0   ;;  %s1469_s13 = smov 0   ;;  %s1604_s0 = inlined_call_operand.vmem [shape: bf16[512,128], index: 0, kind: input, shape index: {}]   ;;  %s1605_s1 = inlined_call_operand.vmem [shape: bf16[128,128], index: 1, kind: input, shape index: {}]   ;;  %s1606_s2 = inlined_call_operand.vmem [shape: f32[1,128], index: 2, kind: input, shape index: {}]   ;;  %s1607_s3 = inlined_call_operand.vmem [shape: bf16[512,128], index: 3, kind: output, shape index: {}]  }
   0x1   :  { %s1471_s14 = smov 0  }
   0x2 LB: > { %s32_s15 = sadd.s32 1, %s1441_s13  ;;  %p1096_p0 = scmp.ge.s32.totalorder %s1445_s14, 1  ;;  %s1445_s14 = sphi %s1471_s14, %s13_s14   ;;  %s1441_s13 = sphi %s1469_s13, %s1609_s13   ;;  %s1437_s12 = sphi %s1467_s12, %s1608_s12  }
   0x3   : > { %p34_p1 = scmp.ge.s32.totalorder %s32_s15, 2  ;;  %p188_p2 = scmp.lt.s32.totalorder %s1445_s14, 3 }
   0x5   : > { %s1611_s15 = smov (%p34_p1, %s32_s15), 0  ;;  %p189_p3 = pnand %p1096_p0, %p188_p2 }
   0x6   : > { %s1097_s18 = sshll.u32 (!%p189_p3), %s1437_s12, 5 }
   0x7   : > { %192 = sbr.rel (%p189_p3) target bundleno = 273 (0x111), region = 32  ;;  %p230_p4 = scmp.lt.s32.totalorder (!%p189_p3), %s1097_s18, 63 }
   0xc   : > { %v1399_v0 = vld [vmem:[%s1605_s1 + $0x38] sm:$0xff]   ;;  %v1400_v1 = vld [vmem:[%s1605_s1 + $0x30] sm:$0xff]   ;;  %s1613_s18 = smov (!%p230_p4, %s1097_s18), 63  ;;  %v1401_v2 = vld [vmem:[%s1605_s1 + $0x28] sm:$0xff]  }
   0xd   : > { %1311 = vmatprep.subr.bf16.mxu0 %v1399_v0  ;;  %1359 = vmatprep.subr.bf16.mxu1 %v1399_v0  ;;  %s1098_s23 = sshll.u32 %s1613_s18, 2  ;;  %v1402_v3 = vld [vmem:[%s1605_s1 + $0x20] sm:$0xff]   ;;  %v1403_v6 = vld [vmem:[%s1605_s1 + $0x18] sm:$0xff]   ;;  %v1404_v7 = vld [vmem:[%s1605_s1 + $0x10] sm:$0xff]  }
   0xe   : > { %1312 = vmatpush3.bf16.msra.mxu0 %v1399_v0  ;;  %1367 = vmatpush3.bf16.msra.mxu1 %v1399_v0  ;;  %s1502_s26 = scalar_lea.vmem %s1604_s0, %s1098_s23  ;;  %v1405_v8 = vld [vmem:[%s1605_s1 + $0x8] sm:$0xff]   ;;  %v1406_v9 = vld [vmem:[%s1605_s1] sm:$0xff]   ;;  %s1551_s17 = scalar_lea.vmem %s1607_s3, %s1098_s23 }
   0xf   : > { %1313 = vmatprep.subr.bf16.mxu0 %v1400_v1  ;;  %1360 = vmatprep.subr.bf16.mxu1 %v1400_v1  ;;  %v1407_v4 = vld [vmem:[%s1502_s26] sm:$0xff]   ;;  %v1409_v10 = vld [vmem:[%s1502_s26 + $0x8] sm:$0xff]   ;;  %v1411_v12 = vld [vmem:[%s1502_s26 + $0x10] sm:$0xff]  }
  0x10   : > { %v1408_v5 = vld [vmem:[%s1502_s26 + $0x40] sm:$0xff]   ;;  %1327 = vmatprep.mubr.bf16.mxu0 %v1407_v4  ;;  %v1410_v11 = vld [vmem:[%s1502_s26 + $0x48] sm:$0xff]   ;;  %v1412_v13 = vld [vmem:[%s1502_s26 + $0x50] sm:$0xff]  }
  0x11   : > { %1343 = vmatprep.mubr.bf16.mxu1 %v1408_v5  ;;  %v1413_v14 = vld [vmem:[%s1502_s26 + $0x18] sm:$0xff]   ;;  %v1415_v16 = vld [vmem:[%s1502_s26 + $0x20] sm:$0xff]   ;;  %v1417_v18 = vld [vmem:[%s1502_s26 + $0x28] sm:$0xff]  }
  0x12   : > { %1314 = vmatpush3.bf16.msra.mxu0 %v1400_v1  ;;  %1368 = vmatpush3.bf16.msra.mxu1 %v1400_v1  ;;  %v1414_v15 = vld [vmem:[%s1502_s26 + $0x58] sm:$0xff]   ;;  %v1416_v17 = vld [vmem:[%s1502_s26 + $0x60] sm:$0xff]   ;;  %v1418_v19 = vld [vmem:[%s1502_s26 + $0x68] sm:$0xff]  }
  0x13   : > { %1315 = vmatprep.subr.bf16.mxu0 %v1401_v2  ;;  %1361 = vmatprep.subr.bf16.mxu1 %v1401_v2  ;;  %v1419_v20 = vld [vmem:[%s1502_s26 + $0x30] sm:$0xff]   ;;  %v1421_v22 = vld [vmem:[%s1502_s26 + $0x38] sm:$0xff]   ;;  %v1538_v26 = vld [vmem:[%s1606_s2] ss:$0 sm:$0xff] }
  0x14   : > { %v1420_v21 = vld [vmem:[%s1502_s26 + $0x70] sm:$0xff]   ;;  %v1422_v23 = vld [vmem:[%s1502_s26 + $0x78] sm:$0xff]  }
  0x16   : > { %1316 = vmatpush3.bf16.msra.mxu0 %v1401_v2  ;;  %1369 = vmatpush3.bf16.msra.mxu1 %v1401_v2 }
  0x17   : > { %1317 = vmatprep.subr.bf16.mxu0 %v1402_v3  ;;  %1362 = vmatprep.subr.bf16.mxu1 %v1402_v3 }
  0x1a   : > { %1318 = vmatpush3.bf16.msra.mxu0 %v1402_v3  ;;  %1370 = vmatpush3.bf16.msra.mxu1 %v1402_v3 }
  0x1b   : > { %1319 = vmatprep.subr.bf16.mxu0 %v1403_v6  ;;  %1363 = vmatprep.subr.bf16.mxu1 %v1403_v6 }
  0x1e   : > { %1320 = vmatpush3.bf16.msra.mxu0 %v1403_v6  ;;  %1371 = vmatpush3.bf16.msra.mxu1 %v1403_v6 }
  0x1f   : > { %1321 = vmatprep.subr.bf16.mxu0 %v1404_v7  ;;  %1364 = vmatprep.subr.bf16.mxu1 %v1404_v7 }
  0x22   : > { %1322 = vmatpush3.bf16.msra.mxu0 %v1404_v7  ;;  %1372 = vmatpush3.bf16.msra.mxu1 %v1404_v7 }
  0x23   : > { %1323 = vmatprep.subr.bf16.mxu0 %v1405_v8  ;;  %1365 = vmatprep.subr.bf16.mxu1 %v1405_v8 }
  0x26   : > { %1324 = vmatpush3.bf16.msra.mxu0 %v1405_v8  ;;  %1373 = vmatpush3.bf16.msra.mxu1 %v1405_v8 }
  0x27   : > { %1325 = vmatprep.subr.bf16.mxu0 %v1406_v9  ;;  %1366 = vmatprep.subr.bf16.mxu1 %v1406_v9 }
  0x2a   : > { %1326 = vmatpush3.bf16.msra.mxu0 %v1406_v9  ;;  %1374 = vmatpush3.bf16.msra.mxu1 %v1406_v9 }
  0x2d   : > { %1328 = vmatmul.mubr.bf16.vlgmr.msra.gmra.mxu0 %v1409_v10  ;;  %1344 = vmatmul.mubr.bf16.vlgmr.msra.gmra.mxu1 %v1410_v11 }
  0x2e   : > { %1331 = vmatprep.mubr.bf16.mxu0 %v1411_v12  ;;  %1347 = vmatprep.mubr.bf16.mxu1 %v1412_v13 }
  0x35   : > { %1332 = vmatmul.mubr.bf16.gmra.mxu0 %v1413_v14  ;;  %1348 = vmatmul.mubr.bf16.gmra.mxu1 %v1414_v15 }
  0x36   : > { %1335 = vmatprep.mubr.bf16.mxu0 %v1415_v16  ;;  %1351 = vmatprep.mubr.bf16.mxu1 %v1416_v17 }
  0x3d   : > { %1336 = vmatmul.mubr.bf16.gmra.mxu0 %v1417_v18  ;;  %1352 = vmatmul.mubr.bf16.gmra.mxu1 %v1418_v19 }
  0x3e   : > { %1339 = vmatprep.mubr.bf16.mxu0 %v1419_v20  ;;  %1355 = vmatprep.mubr.bf16.mxu1 %v1420_v21 }
  0x45   : > { %1340 = vmatmul.mubr.bf16.gmra.mxu0 %v1421_v22  ;;  %1356 = vmatmul.mubr.bf16.gmra.mxu1 %v1422_v23 }
  0xed   : > { %v1329_v24 = vpop.f32.mrf.mxu0  ;;  %v1345_v25 = vpop.f32.mrf.mxu1 }
  0xee   : > { %v789_v31 = vadd.f32 %v1329_v24, %v1538_v26  ;;  %v805_v32 = vadd.f32 %v1345_v25, %v1538_v26 }
  0xef   : > { %v554_v27 = vpop.f32.mrf.mxu0  ;;  %v618_v28 = vpop.f32.mrf.mxu1 }
  0xf0   : > { %v787_v35 = vadd.f32 %v1538_v26, %v554_v27  ;;  %v803_v36 = vadd.f32 %v1538_v26, %v618_v28 }
  0xf1   : > { %v1330_v29 = vpop.f32.mrf.mxu0  ;;  %v1346_v30 = vpop.f32.mrf.mxu1 }
  0xf2   : > { %v790_v33 = vadd.f32 %v1330_v29, %v1538_v26  ;;  %v806_v34 = vadd.f32 %v1346_v30, %v1538_v26 }
  0xf3   : > { %v557_v37 = vpop.f32.mrf.mxu0  ;;  %v621_v38 = vpop.f32.mrf.mxu1 }
  0xf4   : > { %v1200_v39 = vpack.c.bf16 %v790_v33, %v789_v31  ;;  %v1240_v40 = vpack.c.bf16 %v806_v34, %v805_v32  ;;  %v788_v41 = vadd.f32 %v1538_v26, %v557_v37  ;;  %v804_v42 = vadd.f32 %v1538_v26, %v621_v38 }
  0xf5   : > { %v1333_v43 = vpop.f32.mrf.mxu0  ;;  %v1349_v44 = vpop.f32.mrf.mxu1 }
  0xf6   : > { %1272 = vst [vmem:[%s1551_s17 + $0x8] sm:$0xff] %v1200_v39   ;;  %1280 = vst [vmem:[%s1551_s17 + $0x48] sm:$0xff] %v1240_v40   ;;  %v1195_v45 = vpack.c.bf16 %v788_v41, %v787_v35  ;;  %v1235_v46 = vpack.c.bf16 %v804_v42, %v803_v36  ;;  %v793_v51 = vadd.f32 %v1333_v43, %v1538_v26 }
  0xf7   : > { %v570_v47 = vpop.f32.mrf.mxu0  ;;  %v634_v48 = vpop.f32.mrf.mxu1  ;;  %v809_v52 = vadd.f32 %v1349_v44, %v1538_v26 }
  0xf8   : > { %1196 = vst [vmem:[%s1551_s17] sm:$0xff] %v1195_v45   ;;  %1279 = vst [vmem:[%s1551_s17 + $0x40] sm:$0xff] %v1235_v46   ;;  %v791_v55 = vadd.f32 %v1538_v26, %v570_v47  ;;  %v807_v56 = vadd.f32 %v1538_v26, %v634_v48 }
  0xf9   : > { %v1334_v49 = vpop.f32.mrf.mxu0  ;;  %v1350_v50 = vpop.f32.mrf.mxu1 }
  0xfa   : > { %v794_v53 = vadd.f32 %v1334_v49, %v1538_v26  ;;  %v810_v54 = vadd.f32 %v1350_v50, %v1538_v26 }
  0xfb   : > { %v573_v57 = vpop.f32.mrf.mxu0  ;;  %v637_v58 = vpop.f32.mrf.mxu1 }
  0xfc   : > { %v1210_v59 = vpack.c.bf16 %v794_v53, %v793_v51  ;;  %v1250_v60 = vpack.c.bf16 %v810_v54, %v809_v52  ;;  %v792_v61 = vadd.f32 %v1538_v26, %v573_v57  ;;  %v808_v62 = vadd.f32 %v1538_v26, %v637_v58 }
  0xfd   : > { %v1337_v63 = vpop.f32.mrf.mxu0  ;;  %v1353_v0 = vpop.f32.mrf.mxu1 }
  0xfe   : > { %1274 = vst [vmem:[%s1551_s17 + $0x18] sm:$0xff] %v1210_v59   ;;  %1282 = vst [vmem:[%s1551_s17 + $0x58] sm:$0xff] %v1250_v60   ;;  %v1205_v1 = vpack.c.bf16 %v792_v61, %v791_v55  ;;  %v1245_v2 = vpack.c.bf16 %v808_v62, %v807_v56  ;;  %v797_v7 = vadd.f32 %v1337_v63, %v1538_v26 }
  0xff   : > { %v586_v3 = vpop.f32.mrf.mxu0  ;;  %v650_v4 = vpop.f32.mrf.mxu1  ;;  %v813_v8 = vadd.f32 %v1353_v0, %v1538_v26 }
 0x100   : > { %1273 = vst [vmem:[%s1551_s17 + $0x10] sm:$0xff] %v1205_v1   ;;  %1281 = vst [vmem:[%s1551_s17 + $0x50] sm:$0xff] %v1245_v2   ;;  %v795_v11 = vadd.f32 %v1538_v26, %v586_v3  ;;  %v811_v12 = vadd.f32 %v1538_v26, %v650_v4 }
 0x101   : > { %v1338_v5 = vpop.f32.mrf.mxu0  ;;  %v1354_v6 = vpop.f32.mrf.mxu1 }
 0x102   : > { %v798_v9 = vadd.f32 %v1338_v5, %v1538_v26  ;;  %v814_v10 = vadd.f32 %v1354_v6, %v1538_v26 }
 0x103   : > { %v589_v13 = vpop.f32.mrf.mxu0  ;;  %v653_v14 = vpop.f32.mrf.mxu1 }
 0x104   : > { %v1220_v15 = vpack.c.bf16 %v798_v9, %v797_v7  ;;  %v1260_v16 = vpack.c.bf16 %v814_v10, %v813_v8  ;;  %v796_v17 = vadd.f32 %v1538_v26, %v589_v13  ;;  %v812_v18 = vadd.f32 %v1538_v26, %v653_v14 }
 0x105   : > { %v1341_v19 = vpop.f32.mrf.mxu0  ;;  %v1357_v20 = vpop.f32.mrf.mxu1 }
 0x106   : > { %1276 = vst [vmem:[%s1551_s17 + $0x28] sm:$0xff] %v1220_v15   ;;  %1284 = vst [vmem:[%s1551_s17 + $0x68] sm:$0xff] %v1260_v16   ;;  %v1215_v21 = vpack.c.bf16 %v796_v17, %v795_v11  ;;  %v1255_v22 = vpack.c.bf16 %v812_v18, %v811_v12  ;;  %v801_v28 = vadd.f32 %v1341_v19, %v1538_v26 }
 0x107   : > { %v602_v23 = vpop.f32.mrf.mxu0  ;;  %v666_v24 = vpop.f32.mrf.mxu1  ;;  %v817_v29 = vadd.f32 %v1357_v20, %v1538_v26 }
 0x108   : > { %1275 = vst [vmem:[%s1551_s17 + $0x20] sm:$0xff] %v1215_v21   ;;  %1283 = vst [vmem:[%s1551_s17 + $0x60] sm:$0xff] %v1255_v22   ;;  %v799_v32 = vadd.f32 %v1538_v26, %v602_v23  ;;  %v815_v33 = vadd.f32 %v1538_v26, %v666_v24 }
 0x109   : > { %v1342_v25 = vpop.f32.mrf.mxu0  ;;  %v1358_v27 = vpop.f32.mrf.mxu1 }
 0x10a   : > { %v802_v30 = vadd.f32 %v1342_v25, %v1538_v26  ;;  %v818_v31 = vadd.f32 %v1358_v27, %v1538_v26 }
 0x10b   : > { %v605_v34 = vpop.f32.mrf.mxu0  ;;  %v669_v35 = vpop.f32.mrf.mxu1 }
 0x10c   : > { %v1230_v36 = vpack.c.bf16 %v802_v30, %v801_v28  ;;  %v1270_v37 = vpack.c.bf16 %v818_v31, %v817_v29  ;;  %v800_v38 = vadd.f32 %v1538_v26, %v605_v34  ;;  %v816_v39 = vadd.f32 %v1538_v26, %v669_v35 }
 0x10e   : > { %1278 = vst [vmem:[%s1551_s17 + $0x38] sm:$0xff] %v1230_v36   ;;  %1286 = vst [vmem:[%s1551_s17 + $0x78] sm:$0xff] %v1270_v37   ;;  %v1225_v40 = vpack.c.bf16 %v800_v38, %v799_v32  ;;  %v1265_v41 = vpack.c.bf16 %v816_v39, %v815_v33 }
 0x110   : > { %1277 = vst [vmem:[%s1551_s17 + $0x30] sm:$0xff] %v1225_v40   ;;  %1285 = vst [vmem:[%s1551_s17 + $0x70] sm:$0xff] %v1265_v41  }
 0x111 PF: > { %s13_s14 = sadd.s32 1, %s1445_s14   ;;  %s1608_s12 = smov %s1441_s13 }
 0x112   : > { %p10_p5 = scmp.ge.s32.totalorder %s13_s14, 4   ;;  %s1609_s13 = smov %s1611_s15 }
 0x114   :  { %12 = sbr.rel (!%p10_p5) target bundleno = 2 (0x2), region = 76 }

// kernel: inconv_forward.9
= control target key start
LH: loop header
LB: loop body
LE: loop exit
PB: predicated region body
PF: predicated region fallthrough
CT: control target
= control target key end

     0   :  { %s2184_s12 = smov 0   ;;  %s2186_s13 = smov 0   ;;  %s2425_s0 = inlined_call_operand.vmem [shape: bf16[512,384], index: 0, kind: input, shape index: {}]   ;;  %s2426_s1 = inlined_call_operand.vmem [shape: bf16[384,128], index: 1, kind: input, shape index: {}]   ;;  %s2427_s2 = inlined_call_operand.vmem [shape: f32[1,128], index: 2, kind: input, shape index: {}]   ;;  %s2428_s3 = inlined_call_operand.vmem [shape: bf16[512,128], index: 3, kind: output, shape index: {}]  }
   0x1   :  { %s2188_s14 = smov 0  }
   0x2 LB: > { %s32_s15 = sadd.s32 1, %s2158_s13  ;;  %p1588_p0 = scmp.ge.s32.totalorder %s2162_s14, 1  ;;  %s2162_s14 = sphi %s2188_s14, %s13_s14   ;;  %s2158_s13 = sphi %s2186_s13, %s2430_s13   ;;  %s2154_s12 = sphi %s2184_s12, %s2429_s12  }
   0x3   : > { %p34_p1 = scmp.ge.s32.totalorder %s32_s15, 2  ;;  %p191_p2 = scmp.lt.s32.totalorder %s2162_s14, 3 }
   0x5   : > { %s2432_s15 = smov (%p34_p1, %s32_s15), 0  ;;  %p192_p3 = pnand %p1588_p0, %p191_p2 }
   0x6   : > { %s1589_s18 = sshll.u32 (!%p192_p3), %s2154_s12, 5 }
   0x7   : > { %195 = sbr.rel (%p192_p3) target bundleno = 341 (0x155), region = 32  ;;  %p236_p4 = scmp.lt.s32.totalorder (!%p192_p3), %s1589_s18, 63 }
   0xc   : > { %v2052_v0 = vld [vmem:[%s2426_s1 + $0x78] sm:$0xff]   ;;  %v2054_v2 = vld [vmem:[%s2426_s1 + $0x70] sm:$0xff]   ;;  %v2056_v4 = vld [vmem:[%s2426_s1 + $0x68] sm:$0xff]   ;;  %s2434_s18 = smov (!%p236_p4, %s1589_s18), 63 }
   0xd   : > { %v2053_v1 = vld [vmem:[%s2426_s1 + $0x38] sm:$0xff]   ;;  %1827 = vmatprep.subr.bf16.mxu0 %v2052_v0  ;;  %2011 = vmatprep.subr.bf16.mxu1 %v2052_v0  ;;  %v2055_v3 = vld [vmem:[%s2426_s1 + $0x30] sm:$0xff]   ;;  %v2057_v5 = vld [vmem:[%s2426_s1 + $0x28] sm:$0xff]   ;;  %s2027_s4 = smul.u32 12, %s2434_s18  ;;  %s1592_s25 = sshll.u32 %s2434_s18, 2 }
   0xe   : > { %1828 = vmatpush3.bf16.msra.mxu0 %v2053_v1  ;;  %2019 = vmatpush3.bf16.msra.mxu1 %v2053_v1  ;;  %v2058_v6 = vld [vmem:[%s2426_s1 + $0x60] sm:$0xff]   ;;  %v2060_v8 = vld [vmem:[%s2426_s1 + $0x58] sm:$0xff]   ;;  %v2062_v10 = vld [vmem:[%s2426_s1 + $0x50] sm:$0xff]   ;;  %s2359_s28 = scalar_lea.vmem %s2428_s3, %s1592_s25 }
   0xf   : > { %1829 = vmatprep.subr.bf16.mxu0 %v2054_v2  ;;  %2012 = vmatprep.subr.bf16.mxu1 %v2054_v2  ;;  %v2059_v7 = vld [vmem:[%s2426_s1 + $0x20] sm:$0xff]   ;;  %s2235_s11 = scalar_lea.vmem %s2425_s0, %s2027_s4  ;;  %v2061_v9 = vld [vmem:[%s2426_s1 + $0x18] sm:$0xff]   ;;  %v2063_v13 = vld [vmem:[%s2426_s1 + $0x10] sm:$0xff]  }
  0x10   : > { %v2070_v11 = vld [vmem:[%s2235_s11 + $0x4] ss:$12 sps:$4 sm:$0xff]   ;;  %v2064_v14 = vld [vmem:[%s2426_s1 + $0x48] sm:$0xff]   ;;  %v2074_v18 = vld [vmem:[%s2426_s1 + $0xb8] sm:$0xff]  }
  0x11   : > { %v2073_v12 = vld [vmem:[%s2235_s11 + $0x124] ss:$12 sps:$4 sm:$0xff]   ;;  %880 = vmatprep.mubr.bf16.mxu0 %v2070_v11  ;;  %v2065_v15 = vld [vmem:[%s2426_s1 + $0x8] sm:$0xff]   ;;  %v2084_v28 = vld [vmem:[%s2235_s11 + $0x34] ss:$12 sps:$4 sm:$0xff]  }
  0x12   : > { %1830 = vmatpush3.bf16.msra.mxu0 %v2055_v3  ;;  %2020 = vmatpush3.bf16.msra.mxu1 %v2055_v3  ;;  %v2066_v16 = vld [vmem:[%s2426_s1 + $0x40] sm:$0xff]   ;;  %v2076_v21 = vld [vmem:[%s2235_s11 + $0x1c] ss:$12 sps:$4 sm:$0xff]   ;;  %v2075_v22 = vld [vmem:[%s2426_s1 + $0xb0] sm:$0xff]  }
  0x13   : > { %1831 = vmatprep.subr.bf16.mxu0 %v2056_v4  ;;  %2013 = vmatprep.subr.bf16.mxu1 %v2056_v4  ;;  %v2067_v17 = vld [vmem:[%s2426_s1] sm:$0xff]   ;;  %v2078_v23 = vld [vmem:[%s2235_s11 + $0x13c] ss:$12 sps:$4 sm:$0xff]   ;;  %v2091_v33 = vld [vmem:[%s2426_s1 + $0x90] sm:$0xff]  }
  0x14   : > { %976 = vmatprep.mubr.bf16.mxu1 %v2073_v12  ;;  %v2068_v19 = vld [vmem:[%s2235_s11] ss:$12 sps:$4 sm:$0xff]   ;;  %v2080_v24 = vld [vmem:[%s2235_s11 + $0x18] ss:$12 sps:$4 sm:$0xff]   ;;  %v2088_v31 = vld [vmem:[%s2235_s11 + $0x30] ss:$12 sps:$4 sm:$0xff]  }
  0x15   : > { %v2071_v20 = vld [vmem:[%s2235_s11 + $0x120] ss:$12 sps:$4 sm:$0xff]   ;;  %v2081_v26 = vld [vmem:[%s2235_s11 + $0x138] ss:$12 sps:$4 sm:$0xff]   ;;  %v2089_v32 = vld [vmem:[%s2235_s11 + $0x150] ss:$12 sps:$4 sm:$0xff]  }
  0x16   : > { %1832 = vmatpush3.bf16.msra.mxu0 %v2057_v5  ;;  %2021 = vmatpush3.bf16.msra.mxu1 %v2057_v5  ;;  %v2082_v25 = vld [vmem:[%s2426_s1 + $0xa8] sm:$0xff]   ;;  %v2083_v27 = vld [vmem:[%s2426_s1 + $0xa0] sm:$0xff]   ;;  %v2090_v30 = vld [vmem:[%s2426_s1 + $0x98] sm:$0xff]  }
  0x17   : > { %1833 = vmatprep.subr.bf16.mxu0 %v2058_v6  ;;  %2014 = vmatprep.subr.bf16.mxu1 %v2058_v6  ;;  %v2086_v29 = vld [vmem:[%s2235_s11 + $0x154] ss:$12 sps:$4 sm:$0xff]   ;;  %v2092_v34 = vld [vmem:[%s2235_s11 + $0x4c] ss:$12 sps:$4 sm:$0xff]   ;;  %v2100_v39 = vld [vmem:[%s2235_s11 + $0x64] ss:$12 sps:$4 sm:$0xff]  }
  0x18   : > { %v2094_v35 = vld [vmem:[%s2235_s11 + $0x16c] ss:$12 sps:$4 sm:$0xff]   ;;  %v2096_v37 = vld [vmem:[%s2235_s11 + $0x48] ss:$12 sps:$4 sm:$0xff]   ;;  %v2099_v40 = vld [vmem:[%s2426_s1 + $0x80] sm:$0xff]  }
  0x19   : > { %v2098_v36 = vld [vmem:[%s2426_s1 + $0x88] sm:$0xff]   ;;  %v2107_v45 = vld [vmem:[%s2235_s11 + $0x38] ss:$12 sps:$4 sm:$0xff]   ;;  %v2109_v47 = vld [vmem:[%s2235_s11 + $0x50] ss:$12 sps:$4 sm:$0xff]  }
  0x1a   : > { %1834 = vmatpush3.bf16.msra.mxu0 %v2059_v7  ;;  %2022 = vmatpush3.bf16.msra.mxu1 %v2059_v7  ;;  %v2097_v38 = vld [vmem:[%s2235_s11 + $0x168] ss:$12 sps:$4 sm:$0xff]   ;;  %v2103_v42 = vld [vmem:[%s2235_s11 + $0x60] ss:$12 sps:$4 sm:$0xff]   ;;  %v2108_v46 = vld [vmem:[%s2235_s11 + $0x78] ss:$12 sps:$4 sm:$0xff]  }
  0x1b   : > { %1835 = vmatprep.subr.bf16.mxu0 %v2060_v8  ;;  %2015 = vmatprep.subr.bf16.mxu1 %v2060_v8  ;;  %v2102_v41 = vld [vmem:[%s2235_s11 + $0x8] ss:$12 sps:$4 sm:$0xff]   ;;  %v2104_v43 = vld [vmem:[%s2235_s11 + $0x20] ss:$12 sps:$4 sm:$0xff]   ;;  %v2113_v50 = vld [vmem:[%s2235_s11 + $0x90] ss:$12 sps:$4 sm:$0xff]  }
  0x1c   : > { %v2105_v44 = vld [vmem:[%s2235_s11 + $0x7c] ss:$12 sps:$4 sm:$0xff]   ;;  %v2110_v48 = vld [vmem:[%s2235_s11 + $0x94] ss:$12 sps:$4 sm:$0xff]   ;;  %v2115_v52 = vld [vmem:[%s2235_s11 + $0xac] ss:$12 sps:$4 sm:$0xff]  }
  0x1d   : > { %v2112_v49 = vld [vmem:[%s2235_s11 + $0x68] ss:$12 sps:$4 sm:$0xff]   ;;  %v2114_v51 = vld [vmem:[%s2235_s11 + $0x80] ss:$12 sps:$4 sm:$0xff]   ;;  %v2117_v53 = vld [vmem:[%s2235_s11 + $0x98] ss:$12 sps:$4 sm:$0xff]  }
  0x1e   : > { %1836 = vmatpush3.bf16.msra.mxu0 %v2061_v9  ;;  %2023 = vmatpush3.bf16.msra.mxu1 %v2061_v9  ;;  %v2118_v54 = vld [vmem:[%s2235_s11 + $0xa8] ss:$12 sps:$4 sm:$0xff]   ;;  %v2119_v55 = vld [vmem:[%s2235_s11 + $0xb0] ss:$12 sps:$4 sm:$0xff]   ;;  %v2123_v58 = vld [vmem:[%s2235_s11 + $0xc0] ss:$12 sps:$4 sm:$0xff]  }
  0x1f   : > { %1837 = vmatprep.subr.bf16.mxu0 %v2062_v10  ;;  %2016 = vmatprep.subr.bf16.mxu1 %v2062_v10  ;;  %v2120_v56 = vld [vmem:[%s2235_s11 + $0xc4] ss:$12 sps:$4 sm:$0xff]   ;;  %v2122_v57 = vld [vmem:[%s2235_s11 + $0xc8] ss:$12 sps:$4 sm:$0xff]   ;;  %v2124_v59 = vld [vmem:[%s2235_s11 + $0xe0] ss:$12 sps:$4 sm:$0xff]  }
  0x20   : > { %v2125_v60 = vld [vmem:[%s2235_s11 + $0xdc] ss:$12 sps:$4 sm:$0xff]   ;;  %v2127_v61 = vld [vmem:[%s2235_s11 + $0xf8] ss:$12 sps:$4 sm:$0xff]   ;;  %v2130_v0 = vld [vmem:[%s2235_s11 + $0xf4] ss:$12 sps:$4 sm:$0xff]  }
  0x21   : > { %v2128_v62 = vld [vmem:[%s2235_s11 + $0xd8] ss:$12 sps:$4 sm:$0xff]   ;;  %v2129_v63 = vld [vmem:[%s2235_s11 + $0x110] ss:$12 sps:$4 sm:$0xff]   ;;  %v2132_v1 = vld [vmem:[%s2235_s11 + $0x128] ss:$12 sps:$4 sm:$0xff]  }
  0x22   : > { %1838 = vmatpush3.bf16.msra.mxu0 %v2063_v13  ;;  %2024 = vmatpush3.bf16.msra.mxu1 %v2063_v13  ;;  %v2133_v2 = vld [vmem:[%s2235_s11 + $0xf0] ss:$12 sps:$4 sm:$0xff]   ;;  %v2134_v3 = vld [vmem:[%s2235_s11 + $0x140] ss:$12 sps:$4 sm:$0xff]   ;;  %v2137_v5 = vld [vmem:[%s2235_s11 + $0x158] ss:$12 sps:$4 sm:$0xff]  }
  0x23   : > { %1839 = vmatprep.subr.bf16.mxu0 %v2064_v14  ;;  %2017 = vmatprep.subr.bf16.mxu1 %v2064_v14  ;;  %v2135_v4 = vld [vmem:[%s2235_s11 + $0x10c] ss:$12 sps:$4 sm:$0xff]   ;;  %v2138_v6 = vld [vmem:[%s2235_s11 + $0x108] ss:$12 sps:$4 sm:$0xff]   ;;  %v2139_v7 = vld [vmem:[%s2235_s11 + $0x170] ss:$12 sps:$4 sm:$0xff]  }
  0x26   : > { %1840 = vmatpush3.bf16.msra.mxu0 %v2065_v15  ;;  %2025 = vmatpush3.bf16.msra.mxu1 %v2065_v15 }
  0x27   : > { %1841 = vmatprep.subr.bf16.mxu0 %v2066_v16  ;;  %2018 = vmatprep.subr.bf16.mxu1 %v2066_v16 }
  0x2a   : > { %1842 = vmatpush3.bf16.msra.mxu0 %v2067_v17  ;;  %2026 = vmatpush3.bf16.msra.mxu1 %v2067_v17 }
  0x2b   : > { %1963 = vmatprep.subr.bf16.mxu1 %v2074_v18 }
  0x2d   : > { %881 = vmatmul.mubr.bf16.vlgmr.msra.gmra.mxu0 %v2068_v19  ;;  %977 = vmatmul.mubr.bf16.vlgmr.msra.gmra.mxu1 %v2071_v20 }
  0x2e   : > { %1964 = vmatpush3.bf16.msra.mxu1 %v2074_v18  ;;  %888 = vmatprep.mubr.bf16.mxu0 %v2076_v21 }
  0x2f   : > { %1965 = vmatprep.subr.bf16.mxu1 %v2075_v22  ;;  %984 = vmatprep.mubr.bf16.mxu1 %v2078_v23 }
  0x32   : > { %1966 = vmatpush3.bf16.msra.mxu1 %v2075_v22 }
  0x33   : > { %1967 = vmatprep.subr.bf16.mxu1 %v2082_v25 }
  0x35   : > { %889 = vmatmul.mubr.bf16.gmra.mxu0 %v2080_v24  ;;  %985 = vmatmul.mubr.bf16.gmra.mxu1 %v2081_v26 }
  0x36   : > { %1968 = vmatpush3.bf16.msra.mxu1 %v2082_v25  ;;  %896 = vmatprep.mubr.bf16.mxu0 %v2084_v28 }
  0x37   : > { %1969 = vmatprep.subr.bf16.mxu1 %v2083_v27  ;;  %992 = vmatprep.mubr.bf16.mxu1 %v2086_v29 }
  0x3a   : > { %1970 = vmatpush3.bf16.msra.mxu1 %v2083_v27 }
  0x3b   : > { %1971 = vmatprep.subr.bf16.mxu1 %v2090_v30 }
  0x3d   : > { %897 = vmatmul.mubr.bf16.gmra.mxu0 %v2088_v31  ;;  %993 = vmatmul.mubr.bf16.gmra.mxu1 %v2089_v32 }
  0x3e   : > { %1972 = vmatpush3.bf16.msra.mxu1 %v2090_v30  ;;  %904 = vmatprep.mubr.bf16.mxu0 %v2092_v34 }
  0x3f   : > { %1973 = vmatprep.subr.bf16.mxu1 %v2091_v33  ;;  %1000 = vmatprep.mubr.bf16.mxu1 %v2094_v35 }
  0x42   : > { %1974 = vmatpush3.bf16.msra.mxu1 %v2091_v33 }
  0x43   : > { %1975 = vmatprep.subr.bf16.mxu1 %v2098_v36 }
  0x45   : > { %905 = vmatmul.mubr.bf16.gmra.mxu0 %v2096_v37  ;;  %1001 = vmatmul.mubr.bf16.gmra.mxu1 %v2097_v38 }
  0x46   : > { %1976 = vmatpush3.bf16.msra.mxu1 %v2098_v36  ;;  %912 = vmatprep.mubr.bf16.mxu0 %v2100_v39 }
  0x47   : > { %1977 = vmatprep.subr.bf16.mxu1 %v2099_v40  ;;  %1979 = vmatprep.mubr.bf16.mxu1 %v2102_v41 }
  0x4a   : > { %1978 = vmatpush3.bf16.msra.mxu1 %v2099_v40 }
  0x4d   : > { %913 = vmatmul.mubr.bf16.gmra.mxu0 %v2103_v42  ;;  %1980 = vmatmul.mubr.bf16.vlgmr.msra.gmra.mxu1 %v2104_v43 }
  0x4e   : > { %920 = vmatprep.mubr.bf16.mxu0 %v2105_v44  ;;  %1983 = vmatprep.mubr.bf16.mxu1 %v2107_v45 }
  0x55   : > { %921 = vmatmul.mubr.bf16.gmra.mxu0 %v2108_v46  ;;  %1984 = vmatmul.mubr.bf16.gmra.mxu1 %v2109_v47 }
  0x56   : > { %928 = vmatprep.mubr.bf16.mxu0 %v2110_v48  ;;  %1987 = vmatprep.mubr.bf16.mxu1 %v2112_v49 }
  0x5d   : > { %929 = vmatmul.mubr.bf16.gmra.mxu0 %v2113_v50  ;;  %1988 = vmatmul.mubr.bf16.gmra.mxu1 %v2114_v51 }
  0x5e   : > { %936 = vmatprep.mubr.bf16.mxu0 %v2115_v52  ;;  %1991 = vmatprep.mubr.bf16.mxu1 %v2117_v53 }
  0x65   : > { %937 = vmatmul.mubr.bf16.gmra.mxu0 %v2118_v54  ;;  %1992 = vmatmul.mubr.bf16.gmra.mxu1 %v2119_v55  ;;  %v2351_v55 = vld [vmem:[%s2427_s2] ss:$0 sm:$0xff] }
  0x66   : > { %944 = vmatprep.mubr.bf16.mxu0 %v2120_v56  ;;  %1995 = vmatprep.mubr.bf16.mxu1 %v2122_v57 }
  0x6d   : > { %945 = vmatmul.mubr.bf16.gmra.mxu0 %v2123_v58  ;;  %1996 = vmatmul.mubr.bf16.gmra.mxu1 %v2124_v59 }
  0x6e   : > { %952 = vmatprep.mubr.bf16.mxu0 %v2125_v60  ;;  %1999 = vmatprep.mubr.bf16.mxu1 %v2127_v61 }
  0x75   : > { %953 = vmatmul.mubr.bf16.gmra.mxu0 %v2128_v62  ;;  %2000 = vmatmul.mubr.bf16.gmra.mxu1 %v2129_v63 }
  0x76   : > { %960 = vmatprep.mubr.bf16.mxu0 %v2130_v0  ;;  %2003 = vmatprep.mubr.bf16.mxu1 %v2132_v1 }
  0x7d   : > { %961 = vmatmul.mubr.bf16.gmra.mxu0 %v2133_v2  ;;  %2004 = vmatmul.mubr.bf16.gmra.mxu1 %v2134_v3 }
  0x7e   : > { %968 = vmatprep.mubr.bf16.mxu0 %v2135_v4  ;;  %2007 = vmatprep.mubr.bf16.mxu1 %v2137_v5 }
  0x85   : > { %969 = vmatmul.mubr.bf16.gmra.mxu0 %v2138_v6  ;;  %2008 = vmatmul.mubr.bf16.gmra.mxu1 %v2139_v7 }
  0xed   : > { %v1843_v8 = vpop.f32.mrf.mxu0  ;;  %v1915_v9 = vpop.f32.mrf.mxu1 }
  0xef   : > { %v1844_v10 = vpop.f32.mrf.mxu0  ;;  %v1916_v11 = vpop.f32.mrf.mxu1 }
  0xf0   : > { %v2330_v12 = vadd.f32 %v1916_v11, %v1915_v9  ;;  %v1845_v52 = vadd.f32 %v1844_v10, %v1843_v8 }
  0xf1   : > { %v1846_v13 = vpop.f32.mrf.mxu0  ;;  %v1918_v14 = vpop.f32.mrf.mxu1 }
  0xf3   : > { %v1847_v15 = vpop.f32.mrf.mxu0  ;;  %v1919_v16 = vpop.f32.mrf.mxu1 }
  0xf4   : > { %v2332_v17 = vadd.f32 %v1919_v16, %v1918_v14  ;;  %v1848_v58 = vadd.f32 %v1847_v15, %v1846_v13 }
  0xf5   : > { %v1849_v18 = vpop.f32.mrf.mxu0  ;;  %v1921_v19 = vpop.f32.mrf.mxu1 }
  0xf7   : > { %v1850_v20 = vpop.f32.mrf.mxu0  ;;  %v1922_v21 = vpop.f32.mrf.mxu1 }
  0xf8   : > { %v2334_v22 = vadd.f32 %v1922_v21, %v1921_v19  ;;  %v1851_v49 = vadd.f32 %v1850_v20, %v1849_v18 }
  0xf9   : > { %v1852_v23 = vpop.f32.mrf.mxu0  ;;  %v1924_v24 = vpop.f32.mrf.mxu1 }
  0xfb   : > { %v1853_v25 = vpop.f32.mrf.mxu0  ;;  %v1925_v26 = vpop.f32.mrf.mxu1 }
  0xfc   : > { %v2336_v27 = vadd.f32 %v1925_v26, %v1924_v24  ;;  %v1854_v53 = vadd.f32 %v1853_v25, %v1852_v23 }
  0xfd   : > { %v1855_v28 = vpop.f32.mrf.mxu0  ;;  %v1927_v29 = vpop.f32.mrf.mxu1 }
  0xff   : > { %v1856_v30 = vpop.f32.mrf.mxu0  ;;  %v1928_v31 = vpop.f32.mrf.mxu1 }
 0x100   : > { %v2338_v32 = vadd.f32 %v1928_v31, %v1927_v29  ;;  %v1857_v10 = vadd.f32 %v1856_v30, %v1855_v28 }
 0x101   : > { %v1858_v33 = vpop.f32.mrf.mxu0  ;;  %v1930_v34 = vpop.f32.mrf.mxu1 }
 0x103   : > { %v1859_v35 = vpop.f32.mrf.mxu0  ;;  %v1931_v36 = vpop.f32.mrf.mxu1 }
 0x104   : > { %v2340_v37 = vadd.f32 %v1931_v36, %v1930_v34  ;;  %v1860_v18 = vadd.f32 %v1859_v35, %v1858_v33 }
 0x105   : > { %v1861_v38 = vpop.f32.mrf.mxu0  ;;  %v1933_v39 = vpop.f32.mrf.mxu1 }
 0x107   : > { %v1862_v40 = vpop.f32.mrf.mxu0  ;;  %v1934_v41 = vpop.f32.mrf.mxu1 }
 0x108   : > { %v2342_v42 = vadd.f32 %v1934_v41, %v1933_v39  ;;  %v1863_v4 = vadd.f32 %v1862_v40, %v1861_v38 }
 0x109   : > { %v1864_v43 = vpop.f32.mrf.mxu0  ;;  %v2344_v44 = vpop.f32.mrf.mxu1 }
 0x10b   : > { %v1865_v45 = vpop.f32.mrf.mxu0  ;;  %v2346_v46 = vpop.f32.mrf.mxu1 }
 0x10c   : > { %v1866_v11 = vadd.f32 %v1865_v45, %v1864_v43 }
 0x10d   : > { %v1867_v47 = vpop.f32.mrf.mxu0  ;;  %v1981_v48 = vpop.f32.mrf.mxu1 }
 0x10e   : > { %v1052_v54 = vadd.f32 %v1981_v48, %v1851_v49 }
 0x10f   : > { %v1868_v50 = vpop.f32.mrf.mxu0  ;;  %v1043_v51 = vpop.f32.mrf.mxu1 }
 0x110   : > { %v1044_v59 = vadd.f32 %v1845_v52, %v1043_v51  ;;  %v1278_v63 = vadd.f32 %v2351_v55, %v1052_v54  ;;  %v1869_v38 = vadd.f32 %v1868_v50, %v1867_v47 }
 0x111   : > { %v1870_v56 = vpop.f32.mrf.mxu0  ;;  %v1982_v57 = vpop.f32.mrf.mxu1 }
 0x112   : > { %v1055_v60 = vadd.f32 %v1982_v57, %v1854_v53  ;;  %v1276_v5 = vadd.f32 %v2351_v55, %v1044_v59 }
 0x113   : > { %v1871_v61 = vpop.f32.mrf.mxu0  ;;  %v1046_v62 = vpop.f32.mrf.mxu1 }
 0x114   : > { %v1279_v0 = vadd.f32 %v2351_v55, %v1055_v60  ;;  %v1047_v1 = vadd.f32 %v1848_v58, %v1046_v62  ;;  %v1872_v48 = vadd.f32 %v1871_v61, %v1870_v56 }
 0x115   : > { %v1873_v2 = vpop.f32.mrf.mxu0  ;;  %v1985_v3 = vpop.f32.mrf.mxu1 }
 0x116   : > { %v1740_v6 = vpack.c.bf16 %v1279_v0, %v1278_v63  ;;  %v1277_v7 = vadd.f32 %v2351_v55, %v1047_v1  ;;  %v1068_v14 = vadd.f32 %v1985_v3, %v1863_v4 }
 0x117   : > { %v1874_v8 = vpop.f32.mrf.mxu0  ;;  %v1059_v9 = vpop.f32.mrf.mxu1 }
 0x118   : > { %1812 = vst [vmem:[%s2359_s28 + $0x8] sm:$0xff] %v1740_v6   ;;  %v1735_v13 = vpack.c.bf16 %v1277_v7, %v1276_v5  ;;  %v1060_v19 = vadd.f32 %v1857_v10, %v1059_v9  ;;  %v1282_v24 = vadd.f32 %v2351_v55, %v1068_v14  ;;  %v1875_v30 = vadd.f32 %v1874_v8, %v1873_v2 }
 0x119   : > { %v1876_v15 = vpop.f32.mrf.mxu0  ;;  %v1986_v16 = vpop.f32.mrf.mxu1 }
 0x11a   : > { %1736 = vst [vmem:[%s2359_s28] sm:$0xff] %v1735_v13   ;;  %v1071_v20 = vadd.f32 %v1986_v16, %v1866_v11  ;;  %v1280_v31 = vadd.f32 %v2351_v55, %v1060_v19 }
 0x11b   : > { %v1877_v21 = vpop.f32.mrf.mxu0  ;;  %v1062_v23 = vpop.f32.mrf.mxu1 }
 0x11c   : > { %v1283_v25 = vadd.f32 %v2351_v55, %v1071_v20  ;;  %v1063_v26 = vadd.f32 %v1860_v18, %v1062_v23  ;;  %v1878_v39 = vadd.f32 %v1877_v21, %v1876_v15 }
 0x11d   : > { %v1879_v29 = vpop.f32.mrf.mxu0  ;;  %v1989_v28 = vpop.f32.mrf.mxu1 }
 0x11e   : > { %v1750_v34 = vpack.c.bf16 %v1283_v25, %v1282_v24  ;;  %v1281_v33 = vadd.f32 %v2351_v55, %v1063_v26  ;;  %v1084_v41 = vadd.f32 %v1989_v28, %v1875_v30 }
 0x11f   : > { %v1880_v35 = vpop.f32.mrf.mxu0  ;;  %v1075_v36 = vpop.f32.mrf.mxu1 }
 0x120   : > { %1814 = vst [vmem:[%s2359_s28 + $0x18] sm:$0xff] %v1750_v34   ;;  %v1745_v40 = vpack.c.bf16 %v1281_v33, %v1280_v31  ;;  %v1076_v49 = vadd.f32 %v1869_v38, %v1075_v36  ;;  %v1286_v54 = vadd.f32 %v2351_v55, %v1084_v41  ;;  %v1881_v63 = vadd.f32 %v1880_v35, %v1879_v29 }
 0x121   : > { %v1882_v43 = vpop.f32.mrf.mxu0  ;;  %v1990_v45 = vpop.f32.mrf.mxu1 }
 0x122   : > { %1813 = vst [vmem:[%s2359_s28 + $0x10] sm:$0xff] %v1745_v40   ;;  %v1087_v51 = vadd.f32 %v1990_v45, %v1878_v39  ;;  %v1284_v59 = vadd.f32 %v2351_v55, %v1076_v49 }
 0x123   : > { %v1883_v52 = vpop.f32.mrf.mxu0  ;;  %v1078_v53 = vpop.f32.mrf.mxu1 }
 0x124   : > { %v1287_v57 = vadd.f32 %v2351_v55, %v1087_v51  ;;  %v1079_v58 = vadd.f32 %v1872_v48, %v1078_v53  ;;  %v1884_v4 = vadd.f32 %v1883_v52, %v1882_v43 }
 0x125   : > { %v1885_v47 = vpop.f32.mrf.mxu0  ;;  %v1993_v50 = vpop.f32.mrf.mxu1 }
 0x126   : > { %v1760_v60 = vpack.c.bf16 %v1287_v57, %v1286_v54  ;;  %v1285_v62 = vadd.f32 %v2351_v55, %v1079_v58 }
 0x127   : > { %v1886_v56 = vpop.f32.mrf.mxu0  ;;  %v1091_v61 = vpop.f32.mrf.mxu1 }
 0x128   : > { %1816 = vst [vmem:[%s2359_s28 + $0x28] sm:$0xff] %v1760_v60   ;;  %v1755_v0 = vpack.c.bf16 %v1285_v62, %v1284_v59  ;;  %v1887_v1 = vadd.f32 %v1886_v56, %v1885_v47  ;;  %v1092_v5 = vadd.f32 %v1881_v63, %v1091_v61 }
 0x129   : > { %v1888_v2 = vpop.f32.mrf.mxu0  ;;  %v1994_v3 = vpop.f32.mrf.mxu1 }
 0x12a   : > { %1815 = vst [vmem:[%s2359_s28 + $0x20] sm:$0xff] %v1755_v0   ;;  %v1100_v8 = vadd.f32 %v1993_v50, %v1887_v1  ;;  %v1288_v14 = vadd.f32 %v2351_v55, %v1092_v5 }
 0x12b   : > { %v1889_v6 = vpop.f32.mrf.mxu0  ;;  %v1094_v7 = vpop.f32.mrf.mxu1 }
 0x12c   : > { %v1890_v9 = vadd.f32 %v1889_v6, %v1888_v2  ;;  %v1095_v10 = vadd.f32 %v1884_v4, %v1094_v7  ;;  %v1290_v20 = vadd.f32 %v2351_v55, %v1100_v8 }
 0x12d   : > { %v1891_v11 = vpop.f32.mrf.mxu0  ;;  %v1997_v13 = vpop.f32.mrf.mxu1 }
 0x12e   : > { %v1103_v15 = vadd.f32 %v1994_v3, %v1890_v9  ;;  %v1289_v16 = vadd.f32 %v2351_v55, %v1095_v10 }
 0x12f   : > { %v1892_v18 = vpop.f32.mrf.mxu0  ;;  %v1107_v19 = vpop.f32.mrf.mxu1 }
 0x130   : > { %v1291_v21 = vadd.f32 %v2351_v55, %v1103_v15  ;;  %v1765_v23 = vpack.c.bf16 %v1289_v16, %v1288_v14  ;;  %v1893_v24 = vadd.f32 %v1892_v18, %v1891_v11  ;;  %v1938_v15 = vadd.f32 %v2346_v46, %v2344_v44 }
 0x131   : > { %v1894_v25 = vpop.f32.mrf.mxu0  ;;  %v1998_v26 = vpop.f32.mrf.mxu1 }
 0x132   : > { %v1770_v29 = vpack.c.bf16 %v1291_v21, %v1290_v20  ;;  %1817 = vst [vmem:[%s2359_s28 + $0x30] sm:$0xff] %v1765_v23   ;;  %v1108_v31 = vadd.f32 %v1893_v24, %v1107_v19 }
 0x133   : > { %v1895_v28 = vpop.f32.mrf.mxu0  ;;  %v1110_v30 = vpop.f32.mrf.mxu1 }
 0x134   : > { %1818 = vst [vmem:[%s2359_s28 + $0x38] sm:$0xff] %v1770_v29   ;;  %v1896_v34 = vadd.f32 %v1895_v28, %v1894_v25  ;;  %v1292_v40 = vadd.f32 %v2351_v55, %v1108_v31 }
 0x135   : > { %v1897_v33 = vpop.f32.mrf.mxu0  ;;  %v2001_v35 = vpop.f32.mrf.mxu1 }
 0x136   : > { %v1111_v36 = vadd.f32 %v1896_v34, %v1110_v30 }
 0x137   : > { %v1898_v38 = vpop.f32.mrf.mxu0  ;;  %v1123_v39 = vpop.f32.mrf.mxu1 }
 0x138   : > { %v1293_v41 = vadd.f32 %v2351_v55, %v1111_v36  ;;  %v1899_v43 = vadd.f32 %v1898_v38, %v1897_v33 }
 0x139   : > { %v1900_v45 = vpop.f32.mrf.mxu0  ;;  %v2002_v48 = vpop.f32.mrf.mxu1 }
 0x13a   : > { %v1775_v49 = vpack.c.bf16 %v1293_v41, %v1292_v40  ;;  %v1116_v53 = vadd.f32 %v1997_v13, %v1899_v43 }
 0x13b   : > { %v1901_v51 = vpop.f32.mrf.mxu0  ;;  %v1126_v52 = vpop.f32.mrf.mxu1 }
 0x13c   : > { %1819 = vst [vmem:[%s2359_s28 + $0x40] sm:$0xff] %v1775_v49   ;;  %v1902_v54 = vadd.f32 %v1901_v51, %v1900_v45  ;;  %v1294_v62 = vadd.f32 %v2351_v55, %v1116_v53 }
 0x13d   : > { %v1903_v57 = vpop.f32.mrf.mxu0  ;;  %v2005_v58 = vpop.f32.mrf.mxu1 }
 0x13e   : > { %v1119_v47 = vadd.f32 %v1998_v26, %v1902_v54  ;;  %v1148_v50 = vadd.f32 %v2005_v58, %v2334_v22 }
 0x13f   : > { %v1904_v59 = vpop.f32.mrf.mxu0  ;;  %v1139_v60 = vpop.f32.mrf.mxu1 }
 0x140   : > { %v1295_v56 = vadd.f32 %v2351_v55, %v1119_v47  ;;  %v1905_v61 = vadd.f32 %v1904_v59, %v1903_v57  ;;  %v1140_v2 = vadd.f32 %v2330_v12, %v1139_v60  ;;  %v1302_v4 = vadd.f32 %v2351_v55, %v1148_v50 }
 0x141   : > { %v1906_v63 = vpop.f32.mrf.mxu0  ;;  %v2006_v0 = vpop.f32.mrf.mxu1 }
 0x142   : > { %v1780_v1 = vpack.c.bf16 %v1295_v56, %v1294_v62  ;;  %v1151_v3 = vadd.f32 %v2006_v0, %v2336_v27  ;;  %v1124_v22 = vadd.f32 %v1905_v61, %v1123_v39  ;;  %v1300_v13 = vadd.f32 %v2351_v55, %v1140_v2 }
 0x143   : > { %v1907_v5 = vpop.f32.mrf.mxu0  ;;  %v1142_v6 = vpop.f32.mrf.mxu1 }
 0x144   : > { %1820 = vst [vmem:[%s2359_s28 + $0x48] sm:$0xff] %v1780_v1   ;;  %v1303_v7 = vadd.f32 %v2351_v55, %v1151_v3  ;;  %v1908_v8 = vadd.f32 %v1907_v5, %v1906_v63  ;;  %v1143_v9 = vadd.f32 %v2332_v17, %v1142_v6  ;;  %v1296_v20 = vadd.f32 %v2351_v55, %v1124_v22 }
 0x145   : > { %v1909_v10 = vpop.f32.mrf.mxu0  ;;  %v2009_v11 = vpop.f32.mrf.mxu1 }
 0x146   : > { %v1800_v12 = vpack.c.bf16 %v1303_v7, %v1302_v4  ;;  %v1127_v14 = vadd.f32 %v1908_v8, %v1126_v52  ;;  %v1301_v27 = vadd.f32 %v2351_v55, %v1143_v9  ;;  %v1164_v16 = vadd.f32 %v2009_v11, %v2342_v42 }
 0x147   : > { %v1910_v18 = vpop.f32.mrf.mxu0  ;;  %v1155_v19 = vpop.f32.mrf.mxu1 }
 0x148   : > { %1824 = vst [vmem:[%s2359_s28 + $0x68] sm:$0xff] %v1800_v12   ;;  %v1297_v17 = vadd.f32 %v2351_v55, %v1127_v14  ;;  %v1795_v21 = vpack.c.bf16 %v1301_v27, %v1300_v13  ;;  %v1911_v23 = vadd.f32 %v1910_v18, %v1909_v10  ;;  %v1156_v29 = vadd.f32 %v2338_v32, %v1155_v19 }
 0x149   : > { %v1912_v24 = vpop.f32.mrf.mxu0  ;;  %v2010_v25 = vpop.f32.mrf.mxu1  ;;  %v1306_v42 = vadd.f32 %v2351_v55, %v1164_v16 }
 0x14a   : > { %v1785_v26 = vpack.c.bf16 %v1297_v17, %v1296_v20  ;;  %1823 = vst [vmem:[%s2359_s28 + $0x60] sm:$0xff] %v1795_v21   ;;  %v1167_v44 = vadd.f32 %v2010_v25, %v1938_v15  ;;  %v1132_v30 = vadd.f32 %v2001_v35, %v1911_v23  ;;  %v1304_v36 = vadd.f32 %v2351_v55, %v1156_v29 }
 0x14b   : > { %v1913_v46 = vpop.f32.mrf.mxu0  ;;  %v1158_v28 = vpop.f32.mrf.mxu1 }
 0x14c   : > { %1821 = vst [vmem:[%s2359_s28 + $0x50] sm:$0xff] %v1785_v26   ;;  %v1307_v31 = vadd.f32 %v2351_v55, %v1167_v44  ;;  %v1914_v34 = vadd.f32 %v1913_v46, %v1912_v24  ;;  %v1159_v33 = vadd.f32 %v2340_v37, %v1158_v28  ;;  %v1298_v40 = vadd.f32 %v2351_v55, %v1132_v30 }
 0x14e   : > { %v1810_v38 = vpack.c.bf16 %v1307_v31, %v1306_v42  ;;  %v1135_v39 = vadd.f32 %v2002_v48, %v1914_v34  ;;  %v1305_v32 = vadd.f32 %v2351_v55, %v1159_v33 }
 0x150   : > { %1826 = vst [vmem:[%s2359_s28 + $0x78] sm:$0xff] %v1810_v38   ;;  %v1299_v41 = vadd.f32 %v2351_v55, %v1135_v39  ;;  %v1805_v43 = vpack.c.bf16 %v1305_v32, %v1304_v36 }
 0x152   : > { %v1790_v45 = vpack.c.bf16 %v1299_v41, %v1298_v40  ;;  %1825 = vst [vmem:[%s2359_s28 + $0x70] sm:$0xff] %v1805_v43  }
 0x154   : > { %1822 = vst [vmem:[%s2359_s28 + $0x58] sm:$0xff] %v1790_v45  }
 0x155 PF: > { %s13_s14 = sadd.s32 1, %s2162_s14   ;;  %s2429_s12 = smov %s2158_s13 }
 0x156   : > { %p10_p5 = scmp.ge.s32.totalorder %s13_s14, 4   ;;  %s2430_s13 = smov %s2432_s15 }
 0x158   :  { %12 = sbr.rel (!%p10_p5) target bundleno = 2 (0x2), region = 76 }

</bundles_post_ra>
